<compile_context>
chip_gen: v5e
topology: v5e:2x2
jax: 0.10.0
libtpu: 0.0.40
codegen_flags: <defaults>
</compile_context>

<pallas_src>
import functools
import math

import jax
import jax.numpy as jnp
from jax import lax
from jax.experimental import pallas as pl
from jax.experimental.pallas import tpu as pltpu


def _pick_block(dim, cap, align):
    """Largest divisor of `dim` <= cap, preferring multiples of `align`."""
    if dim <= cap:
        return dim
    fallback = dim
    for t in range(cap, 0, -1):
        if dim % t == 0:
            if t % align == 0:
                return t
            if fallback == dim:
                fallback = t
    return fallback


# ----------------------------------------------------------------------------
# Kernel 1: tiled matmul  y = x @ w   (w already laid out (K, N))
# ----------------------------------------------------------------------------
def _matmul_kernel(x_ref, w_ref, o_ref, acc_ref):
    @pl.when(pl.program_id(2) == 0)
    def _init():
        acc_ref[...] = jnp.zeros_like(acc_ref)

    acc_ref[...] += jnp.dot(x_ref[...], w_ref[...],
                            preferred_element_type=jnp.float32)

    @pl.when(pl.program_id(2) == pl.num_programs(2) - 1)
    def _finalize():
        o_ref[...] = acc_ref[...].astype(o_ref.dtype)


def matmul(x, w, *, out_dtype=None, bm=512, bn=512, bk=None):
    M, K = x.shape
    Kw, N = w.shape
    assert K == Kw
    out_dtype = x.dtype if out_dtype is None else out_dtype
    if bk is None:
        bk = K if K <= 1024 else 512          # full-K contraction when cheap
    bm = _pick_block(M, bm, 8)
    bn = _pick_block(N, bn, 128)
    bk = _pick_block(K, bk, 128)
    grid = (M // bm, N // bn, K // bk)
    return pl.pallas_call(
        _matmul_kernel,
        out_shape=jax.ShapeDtypeStruct((M, N), out_dtype),
        grid_spec=pltpu.PrefetchScalarGridSpec(
            num_scalar_prefetch=0,
            grid=grid,
            in_specs=[
                pl.BlockSpec((bm, bk), lambda i, j, k: (i, k)),
                pl.BlockSpec((bk, bn), lambda i, j, k: (k, j)),
            ],
            out_specs=pl.BlockSpec((bm, bn), lambda i, j, k: (i, j)),
            scratch_shapes=[pltpu.VMEM((bm, bn), jnp.float32)],
        ),
        compiler_params=pltpu.CompilerParams(
            dimension_semantics=("parallel", "parallel", "arbitrary"),
            vmem_limit_bytes=32 * 1024 * 1024,
        ),
    )(x, w)


# ----------------------------------------------------------------------------
# Kernel 2: flash-style attention (online softmax, no probs writeback)
# ----------------------------------------------------------------------------
def _flash_attn_kernel(q_ref, k_ref, v_ref, *rest, causal, has_mask):
    if has_mask:
        mask_ref, o_ref, m_sc, l_sc, acc_sc = rest
    else:
        o_ref, m_sc, l_sc, acc_sc = rest

    bq = q_ref.shape[1]
    bkv = k_ref.shape[1]
    qi = pl.program_id(2)
    kv_i = pl.program_id(3)

    @pl.when(kv_i == 0)
    def _init():
        m_sc[...] = jnp.full_like(m_sc, -jnp.inf)
        l_sc[...] = jnp.zeros_like(l_sc)
        acc_sc[...] = jnp.zeros_like(acc_sc)

    def _compute():
        q = q_ref[0]                    # (bq, d_k); 1/sqrt(d_k) folded into w_q
        k = k_ref[0]                    # (bkv, d_k)
        # QK^T without transposing K: contract the d_k axis of both operands.
        s = lax.dot_general(q, k, (((1,), (1,)), ((), ())),
                            preferred_element_type=jnp.float32)  # (bq, bkv)
        if has_mask:
            s = jnp.where(mask_ref[0, 0] == 0, jnp.float32(-1e9), s)
        if causal:
            row = qi * bq + lax.broadcasted_iota(jnp.int32, (bq, bkv), 0)
            col = kv_i * bkv + lax.broadcasted_iota(jnp.int32, (bq, bkv), 1)
            s = jnp.where(col > row, jnp.float32(-1e9), s)

        m_prev = m_sc[...]
        m_new = jnp.maximum(m_prev, jnp.max(s, axis=-1, keepdims=True))
        alpha = jnp.exp(m_prev - m_new)
        p = jnp.exp(s - m_new)
        l_sc[...] = alpha * l_sc[...] + jnp.sum(p, axis=-1, keepdims=True)
        acc_sc[...] = alpha * acc_sc[...] + jnp.dot(
            p.astype(v_ref.dtype), v_ref[0], preferred_element_type=jnp.float32)
        m_sc[...] = m_new

    if causal:
        # Skip KV tiles that lie entirely above the diagonal (fully masked).
        pl.when(kv_i * bkv < (qi + 1) * bq)(_compute)
    else:
        _compute()

    @pl.when(kv_i == pl.num_programs(3) - 1)
    def _finalize():
        inv_l = pl.reciprocal(l_sc[...], approx=True)
        o_ref[0] = (acc_sc[...] * inv_l).astype(o_ref.dtype)


def flash_attention(qp, kp, vp, mask, h, d_k, head_offsets, *,
                    causal, block_q, block_kv, out_dtype):
    B, S = qp.shape[0], qp.shape[1]
    d_model = h * d_k
    bq = _pick_block(S, block_q, 8)
    bkv = _pick_block(S, block_kv, 8)
    qo, ko, vo = head_offsets
    has_mask = (mask is not None) and (not causal)

    in_specs = [
        pl.BlockSpec((1, bq, d_k), lambda b, hh, qi, ki: (b, qi, hh + qo)),
        pl.BlockSpec((1, bkv, d_k), lambda b, hh, qi, ki: (b, ki, hh + ko)),
        pl.BlockSpec((1, bkv, d_k), lambda b, hh, qi, ki: (b, ki, hh + vo)),
    ]
    inputs = [qp, kp, vp]
    if has_mask:
        if mask.dtype != jnp.int8:                       # 4x less mask DMA vs int32
            mask = (mask != 0).astype(jnp.int8)
        mb = 1 if mask.shape[0] != 1 else 0
        mh = 1 if mask.shape[1] != 1 else 0
        in_specs.append(pl.BlockSpec(
            (1, 1, bq, bkv), lambda b, hh, qi, ki: (b * mb, hh * mh, qi, ki)))
        inputs.append(mask)

    kernel = functools.partial(_flash_attn_kernel, causal=causal, has_mask=has_mask)
    grid = (B, h, S // bq, S // bkv)
    return pl.pallas_call(
        kernel,
        out_shape=jax.ShapeDtypeStruct((B, S, d_model), out_dtype),
        grid_spec=pltpu.PrefetchScalarGridSpec(
            num_scalar_prefetch=0,
            grid=grid,
            in_specs=in_specs,
            out_specs=pl.BlockSpec((1, bq, d_k),
                                   lambda b, hh, qi, ki: (b, qi, hh)),
            scratch_shapes=[
                pltpu.VMEM((bq, 1), jnp.float32),    # running max
                pltpu.VMEM((bq, 1), jnp.float32),    # running denom
                pltpu.VMEM((bq, d_k), jnp.float32),  # output accumulator
            ],
        ),
        compiler_params=pltpu.CompilerParams(
            dimension_semantics=("parallel", "parallel", "parallel", "arbitrary"),
            vmem_limit_bytes=32 * 1024 * 1024,
        ),
    )(*inputs)


# ----------------------------------------------------------------------------
# Kernel 3: attention with full probability writeback (only when requested)
# ----------------------------------------------------------------------------
def _attn_scores_kernel(q_ref, k_ref, v_ref, *rest, causal, has_mask):
    if has_mask:
        mask_ref, o_ref, p_ref = rest
    else:
        o_ref, p_ref = rest

    bq = q_ref.shape[1]
    S = k_ref.shape[1]
    qi = pl.program_id(2)

    q = q_ref[0]                    # (bq, d_k)
    k = k_ref[0]                    # (S, d_k)
    v = v_ref[0]                    # (S, d_k)
    s = lax.dot_general(q, k, (((1,), (1,)), ((), ())),
                        preferred_element_type=jnp.float32)  # (bq, S)
    if has_mask:
        s = jnp.where(mask_ref[0, 0] == 0, jnp.float32(-1e9), s)
    if causal:
        row = qi * bq + lax.broadcasted_iota(jnp.int32, (bq, S), 0)
        col = lax.broadcasted_iota(jnp.int32, (bq, S), 1)
        s = jnp.where(col > row, jnp.float32(-1e9), s)
    s = s - jnp.max(s, axis=-1, keepdims=True)
    p = jnp.exp(s)
    p = p * pl.reciprocal(jnp.sum(p, axis=-1, keepdims=True), approx=True)
    o_ref[0] = jnp.dot(p.astype(v.dtype), v,
                       preferred_element_type=jnp.float32).astype(o_ref.dtype)
    p_ref[0, 0] = p.astype(p_ref.dtype)


def attention_with_scores(qp, kp, vp, mask, h, d_k, head_offsets, *,
                          causal, block_q, out_dtype):
    # NOTE(v7x): full-S K/V blocks + (bq,S) temporaries grow linearly with S;
    # tile S here if this path is used with long sequences on 64 MiB VMEM.
    B, S = qp.shape[0], qp.shape[1]
    d_model = h * d_k
    bq = _pick_block(S, block_q, 8)
    qo, ko, vo = head_offsets
    has_mask = (mask is not None) and (not causal)

    in_specs = [
        pl.BlockSpec((1, bq, d_k), lambda b, hh, qi: (b, qi, hh + qo)),
        pl.BlockSpec((1, S, d_k), lambda b, hh, qi: (b, 0, hh + ko)),
        pl.BlockSpec((1, S, d_k), lambda b, hh, qi: (b, 0, hh + vo)),
    ]
    inputs = [qp, kp, vp]
    if has_mask:
        if mask.dtype != jnp.int8:
            mask = (mask != 0).astype(jnp.int8)
        mb = 1 if mask.shape[0] != 1 else 0
        mh = 1 if mask.shape[1] != 1 else 0
        in_specs.append(pl.BlockSpec(
            (1, 1, bq, S), lambda b, hh, qi: (b * mb, hh * mh, qi, 0)))
        inputs.append(mask)

    kernel = functools.partial(_attn_scores_kernel, causal=causal, has_mask=has_mask)
    grid = (B, h, S // bq)
    return pl.pallas_call(
        kernel,
        out_shape=(
            jax.ShapeDtypeStruct((B, S, d_model), out_dtype),
            # probs written in compute dtype (bf16 by default) to halve the
            # O(B*h*S^2) writeback traffic.
            jax.ShapeDtypeStruct((B, h, S, S), out_dtype),
        ),
        grid_spec=pltpu.PrefetchScalarGridSpec(
            num_scalar_prefetch=0,
            grid=grid,
            in_specs=in_specs,
            out_specs=(
                pl.BlockSpec((1, bq, d_k), lambda b, hh, qi: (b, qi, hh)),
                pl.BlockSpec((1, 1, bq, S), lambda b, hh, qi: (b, hh, qi, 0)),
            ),
        ),
        compiler_params=pltpu.CompilerParams(
            dimension_semantics=("parallel", "parallel", "parallel"),
            vmem_limit_bytes=32 * 1024 * 1024,
        ),
    )(*inputs)


# ----------------------------------------------------------------------------
# Weight preparation (hoist out of the per-call forward)
# ----------------------------------------------------------------------------
def prepare_mha_weights(params, h, *, compute_dtype=jnp.bfloat16):
    """Pre-transpose weights to (in, out), fold 1/sqrt(d_k) into w_q, cast to
    the compute dtype, and build the fused QKV weight. Call once, reuse."""
    d_model = params["w_q"].shape[0]
    d_k = d_model // h
    scale = 1.0 / math.sqrt(d_k)
    wq_t = (params["w_q"] * scale).T.astype(compute_dtype)
    wk_t = params["w_k"].T.astype(compute_dtype)
    wv_t = params["w_v"].T.astype(compute_dtype)
    wo_t = params["w_o"].T.astype(compute_dtype)
    return {
        "wq_t": wq_t, "wk_t": wk_t, "wv_t": wv_t, "wo_t": wo_t,
        "w_qkv_t": jnp.concatenate([wq_t, wk_t, wv_t], axis=1),
        "compute_dtype": compute_dtype,
    }


# ----------------------------------------------------------------------------
# MultiHeadAttentionBlock forward
# ----------------------------------------------------------------------------
def multi_head_attention(q, k, v, mask, params=None, h=None, *,
                         prepared=None,
                         causal=False,
                         dropout_rate=0.0,
                         return_scores=False,
                         compute_dtype=jnp.bfloat16,
                         block_q=512, block_kv=512):
    """Forward pass of MultiHeadAttentionBlock (eval mode).

    q, k, v : (B, S, d_model); mask broadcastable to (B, 1, S, S), 0 = masked.
    params  : dict of PyTorch-layout weights (out_features, in_features);
              alternatively pass `prepared=prepare_mha_weights(...)` (hoisted).
    causal  : if True, drop the mask tensor entirely and apply a causal mask
              in-kernel (also skips fully-masked KV tiles).
    Returns output (B, S, d_model); with return_scores=True also the softmax
    attention probabilities (B, h, S, S) in the compute dtype.
    """
    del dropout_rate  # TODO(synk): dropout is identity in eval mode.
    assert h is not None
    B, S, d_model = q.shape
    assert d_model % h == 0
    d_k = d_model // h
    assert d_k % 128 == 0, "lane-dense head layout requires d_k % 128 == 0"
    out_dtype = q.dtype

    if prepared is None:
        prepared = prepare_mha_weights(params, h, compute_dtype=compute_dtype)
    compute_dtype = prepared["compute_dtype"]

    def as2d(x):
        return x.reshape(B * S, d_model).astype(compute_dtype)

    if (q is k) and (k is v):
        # Self-attention: fused QKV projection — x streamed from HBM once.
        qkv = matmul(as2d(q), prepared["w_qkv_t"], out_dtype=compute_dtype)
        qkv = qkv.reshape(B, S, 3 * d_model)
        # Attention kernels read heads straight out of the fused buffer via
        # BlockSpec column-block offsets (no slicing / transposing).
        qp = kp = vp = qkv
        offsets = (0, h, 2 * h)
    else:
        qp = matmul(as2d(q), prepared["wq_t"], out_dtype=compute_dtype).reshape(B, S, d_model)
        kp = matmul(as2d(k), prepared["wk_t"], out_dtype=compute_dtype).reshape(B, S, d_model)
        vp = matmul(as2d(v), prepared["wv_t"], out_dtype=compute_dtype).reshape(B, S, d_model)
        offsets = (0, 0, 0)

    if return_scores:
        ctx, scores = attention_with_scores(
            qp, kp, vp, mask, h, d_k, offsets,
            causal=causal, block_q=block_q, out_dtype=compute_dtype)
    else:
        ctx = flash_attention(
            qp, kp, vp, mask, h, d_k, offsets,
            causal=causal, block_q=block_q, block_kv=block_kv,
            out_dtype=compute_dtype)
        scores = None

    out = matmul(ctx.reshape(B * S, d_model), prepared["wo_t"],
                 out_dtype=out_dtype).reshape(B, S, d_model)
    if return_scores:
        return out, scores
    return out


# ----------------------------------------------------------------------------
# Pure-JAX reference (mirrors the PyTorch module, eval mode)
# ----------------------------------------------------------------------------
def reference_mha(q, k, v, mask, params, h):
    B, S, d_model = q.shape
    d_k = d_model // h
    query = q @ params["w_q"].T
    key = k @ params["w_k"].T
    value = v @ params["w_v"].T

    def split(x):
        return x.reshape(B, S, h, d_k).transpose(0, 2, 1, 3)

    qh, kh, vh = split(query), split(key), split(value)
    scores = jnp.einsum("bhqd,bhkd->bhqk", qh, kh) / math.sqrt(d_k)
    scores = jnp.where(mask == 0, -1e9, scores)
    probs = jax.nn.softmax(scores, axis=-1)
    ctx = jnp.einsum("bhqk,bhkd->bhqd", probs, vh)
    ctx = ctx.transpose(0, 2, 1, 3).reshape(B, S, d_model)
    return ctx @ params["w_o"].T, probs


if __name__ == "__main__":
    # Small but lane-aligned shapes: d_k = 128, S multiple of 128.
    B, S, d_model, h = 2, 256, 256, 2

    root = jax.random.PRNGKey(0)
    kx, kq, kk, kv, kwq, kwk, kwv, kwo = jax.random.split(root, 8)

    x = jax.random.normal(kx, (B, S, d_model), dtype=jnp.float32)
    q = jax.random.normal(kq, (B, S, d_model), dtype=jnp.float32)
    k = jax.random.normal(kk, (B, S, d_model), dtype=jnp.float32)
    v = jax.random.normal(kv, (B, S, d_model), dtype=jnp.float32)

    # deterministic "nn.Linear"-style init: U(-1/sqrt(d_model), 1/sqrt(d_model))
    bound = 1.0 / math.sqrt(d_model)
    params = {
        "w_q": jax.random.uniform(kwq, (d_model, d_model), jnp.float32, -bound, bound),
        "w_k": jax.random.uniform(kwk, (d_model, d_model), jnp.float32, -bound, bound),
        "w_v": jax.random.uniform(kwv, (d_model, d_model), jnp.float32, -bound, bound),
        "w_o": jax.random.uniform(kwo, (d_model, d_model), jnp.float32, -bound, bound),
    }

    # causal mask (B, 1, S, S), 0 = masked
    causal_tri = jnp.tril(jnp.ones((S, S), dtype=jnp.int32))
    mask = jnp.broadcast_to(causal_tri[None, None], (B, 1, S, S))

    ref_self, _ = reference_mha(x, x, x, mask, params, h)
    ref_cross, ref_attn = reference_mha(q, k, v, mask, params, h)

    # 1) self-attention, causal fast path (no mask HBM stream, tile skipping),
    #    f32 compute, multi-step online softmax (block 128 on S=256).
    out_causal = multi_head_attention(
        x, x, x, None, params, h, causal=True,
        compute_dtype=jnp.float32, block_q=128, block_kv=128)
    out_causal = jax.block_until_ready(out_causal)
    assert out_causal.shape == (B, S, d_model)
    assert jnp.allclose(out_causal, ref_self, atol=2e-2, rtol=2e-2)

    # 2) self-attention with an explicit (int8) mask tensor, f32 compute.
    out_mask = multi_head_attention(
        x, x, x, mask, params, h,
        compute_dtype=jnp.float32, block_q=128, block_kv=128)
    out_mask = jax.block_until_ready(out_mask)
    assert jnp.allclose(out_mask, ref_self, atol=2e-2, rtol=2e-2)

    # 3) cross-attention, f32 compute: separate projections + probs writeback.
    out_s, attn_s = multi_head_attention(
        q, k, v, mask, params, h, return_scores=True,
        compute_dtype=jnp.float32, block_q=128)
    out_s = jax.block_until_ready(out_s)
    attn_s = jax.block_until_ready(attn_s)
    assert attn_s.shape == (B, h, S, S)
    assert jnp.allclose(out_s, ref_cross, atol=2e-2, rtol=2e-2)
    assert jnp.allclose(attn_s, ref_attn, atol=2e-2, rtol=2e-2)

    # 4) default bf16 matmuls with f32 accumulation, hoisted prepared weights,
    #    causal fast path.
    prepared = prepare_mha_weights(params, h, compute_dtype=jnp.bfloat16)
    out_bf16 = multi_head_attention(
        x, x, x, None, None, h, prepared=prepared, causal=True,
        block_q=128, block_kv=128)
    out_bf16 = jax.block_until_ready(out_bf16)
    assert out_bf16.dtype == jnp.float32
    assert jnp.allclose(out_bf16, ref_self, atol=4e-2, rtol=4e-2)

    print("KERNEL_OK")
</pallas_src>

<mosaic_0001>
module attributes {stable_mosaic.version = 11 : i64} {
  func.func @_matmul_kernel(%arg0: i32, %arg1: i32, %arg2: i32, %arg3: memref<512x256xf32, #tpu.memory_space<vmem>>, %arg4: memref<256x384xf32, #tpu.memory_space<vmem>>, %arg5: memref<512x384xf32, #tpu.memory_space<vmem>>, %arg6: memref<512x384xf32, #tpu.memory_space<vmem>>) attributes {dimension_semantics = [#tpu.dimension_semantics<parallel>, #tpu.dimension_semantics<parallel>, #tpu.dimension_semantics<arbitrary>], iteration_bounds = array<i64: 1, 2, 1>, scalar_prefetch = 0 : i64, scratch_operands = 1 : i64, tpu.core_type = #tpu.core_type<tc>, window_params = [{transform_indices = @transform_0, window_bounds = array<i64: 512, 256>}, {transform_indices = @transform_1, window_bounds = array<i64: 256, 384>}, {transform_indices = @transform_2, window_bounds = array<i64: 512, 384>}]} {
    %c0_i32 = arith.constant 0 : i32
    %0 = arith.cmpi eq, %arg2, %c0_i32 : i32
    %1 = arith.extui %0 : i1 to i32
    %c0_i32_0 = arith.constant 0 : i32
    %2 = arith.cmpi ne, %1, %c0_i32_0 : i32
    scf.if %2 {
      %cst_10 = arith.constant 0.000000e+00 : f32
      %12 = vector.broadcast %cst_10 : f32 to vector<512x384xf32>
      %c0_11 = arith.constant 0 : index
      %c0_12 = arith.constant 0 : index
      %13 = vector.load %arg6[%c0_11, %c0_12] : memref<512x384xf32, #tpu.memory_space<vmem>>, vector<512x384xf32>
      tpu.vector_store %arg6[%c0_11, %c0_12], %12 {strides = array<i32>} : memref<512x384xf32, #tpu.memory_space<vmem>>, vector<512x384xf32>,
    } else {
    }
    %c0 = arith.constant 0 : index
    %c0_1 = arith.constant 0 : index
    %3 = vector.load %arg6[%c0, %c0_1] : memref<512x384xf32, #tpu.memory_space<vmem>>, vector<512x384xf32>
    %c0_2 = arith.constant 0 : index
    %c0_3 = arith.constant 0 : index
    %4 = vector.load %arg3[%c0_2, %c0_3] : memref<512x256xf32, #tpu.memory_space<vmem>>, vector<512x256xf32>
    %c0_4 = arith.constant 0 : index
    %c0_5 = arith.constant 0 : index
    %5 = vector.load %arg4[%c0_4, %c0_5] : memref<256x384xf32, #tpu.memory_space<vmem>>, vector<256x384xf32>
    %cst = arith.constant dense<0.000000e+00> : vector<512x384xf32>
    %6 = tpu.matmul %4, %5, %cst {dimension_numbers = #tpu.dot_dimension_numbers<[1], [0], [0], [1], [0, 0, 1, 1], [], []>} : vector<512x256xf32>, vector<256x384xf32>, vector<512x384xf32> -> vector<512x384xf32>
    %7 = arith.addf %3, %6 : vector<512x384xf32>
    %c0_6 = arith.constant 0 : index
    %c0_7 = arith.constant 0 : index
    %8 = vector.load %arg6[%c0_6, %c0_7] : memref<512x384xf32, #tpu.memory_space<vmem>>, vector<512x384xf32>
    tpu.vector_store %arg6[%c0_6, %c0_7], %7 {strides = array<i32>} : memref<512x384xf32, #tpu.memory_space<vmem>>, vector<512x384xf32>,
    %c0_i32_8 = arith.constant 0 : i32
    %9 = arith.cmpi eq, %arg2, %c0_i32_8 : i32
    %10 = arith.extui %9 : i1 to i32
    %c0_i32_9 = arith.constant 0 : i32
    %11 = arith.cmpi ne, %10, %c0_i32_9 : i32
    scf.if %11 {
      %c0_10 = arith.constant 0 : index
      %c0_11 = arith.constant 0 : index
      %12 = vector.load %arg6[%c0_10, %c0_11] : memref<512x384xf32, #tpu.memory_space<vmem>>, vector<512x384xf32>
      %c0_12 = arith.constant 0 : index
      %c0_13 = arith.constant 0 : index
      %13 = vector.load %arg5[%c0_12, %c0_13] : memref<512x384xf32, #tpu.memory_space<vmem>>, vector<512x384xf32>
      tpu.vector_store %arg5[%c0_12, %c0_13], %12 {strides = array<i32>} : memref<512x384xf32, #tpu.memory_space<vmem>>, vector<512x384xf32>,
    } else {
    }
    return
  }
  func.func @transform_0(%arg0: i32, %arg1: i32, %arg2: i32) -> (i32, i32) {
    %c0_i32 = arith.constant 0 : i32
    return %arg0, %arg2 : i32, i32
  }
  func.func @transform_1(%arg0: i32, %arg1: i32, %arg2: i32) -> (i32, i32) {
    %c0_i32 = arith.constant 0 : i32
    return %arg2, %arg1 : i32, i32
  }
  func.func @transform_2(%arg0: i32, %arg1: i32, %arg2: i32) -> (i32, i32) {
    %c0_i32 = arith.constant 0 : i32
    return %arg0, %arg1 : i32, i32
  }
}

</mosaic_0001>

<bundles_post_ra>
// kernel: tpu_custom_call.1
= control target key start
LH: loop header
LB: loop body
LE: loop exit
PB: predicated region body
PF: predicated region fallthrough
CT: control target
= control target key end

     0   :  { %7 = vsyncpa [#allocation4], 0  ;;  %s4111_s0 = inlined_call_operand.hbm [shape: f32[512,256], index: 0, kind: input, shape index: {}]   ;;  %s4112_s1 = inlined_call_operand.hbm [shape: f32[256,768], index: 1, kind: input, shape index: {}]   ;;  %s4113_s2 = inlined_call_operand.hbm [shape: f32[512,768], index: 2, kind: output, shape index: {}]  }
   0x1   :  { %8 = vsyncpa [#allocation7], 0 }
   0x2   :  { %10 = vsyncpa [#allocation7 + $0x1], 0 }
   0x3   :  { %11 = vsyncpa [#allocation5], 0 }
   0x4   :  { %13 = vsyncpa [#allocation5 + $0x1], 0  ;;  %s3356_s9 = smov 0   ;;  %s3358_s10 = smov 0  }
   0x5   :  { %s3360_s11 = smov 0   ;;  %s3362_s12 = smov 0  }
   0x6   :  { %s3364_s13 = smov 0   ;;  %s3366_s14 = smov 0  }
   0x7 LB: > { %s2989_s15 = sadd.s32 4294967295, %s3330_s14   ;;  %s2990_s16 = sadd.s32 4294967294, %s3330_s14   ;;  %s3330_s14 = sphi %s3366_s14, %s19_s14   ;;  %s3326_s13 = sphi %s3364_s13, %s4168_s13   ;;  %s3322_s12 = sphi %s3362_s12, %s4167_s12   ;;  %s3318_s11 = sphi %s3360_s11, %s4166_s11   ;;  %s3314_s10 = sphi %s3358_s10, %s4165_s10   ;;  %s3310_s9 = sphi %s3356_s9, %s4164_s9  }
   0x8   : > { %p88_p0 = scmp.ne.s32.totalorder %s3314_s10, %s3310_s9  ;;  %p3390_p1 = scmp.eq.s32.totalorder %s2989_s15, 0 }
   0x9   : > { %p3394_p2 = scmp.eq.s32.totalorder %s2989_s15, 1  ;;  %p120_p3 = scmp.eq.s32.totalorder %s2990_s16, 1 }
   0xa   : > { %p3400_p4 = por %p3390_p1, %p88_p0  ;;  %p2991_p5 = scmp.ge.s32.totalorder %s3330_s14, 1 }
   0xb   : > { %p3405_p6 = por %p120_p3, %p88_p0  ;;  %p127_p7 = scmp.lt.s32.totalorder %s3330_s14, 3 }
   0xc   : > { %s144_s23 = sshll.u32 %s4111_s0, 4  ;;  %s3332_s25 = smov [#allocation3]   ;;  %s145_s23 = int_to_ptr.hbm [resolvable:$true] %s144_s23 }
   0xd   : > { %p3413_p8 = pnand %p2991_p5, %p127_p7  ;;  %s146_s26 = sshll.u32 %s3332_s25, 4  ;;  %s147_s26 = int_to_ptr.vmem [resolvable:$true] %s146_s26 }
   0xe   : > { %p2993_p11 = scmp.ge.s32.totalorder %s3330_s14, 2  ;;  %s3333_s27 = smov 256  }
   0xf   : > { %p3045_p9 = pneg %p3413_p8  ;;  %s3334_s28 = smov 16  }
  0x10   : > { %s34_s29 = sadd.s32 1, %s3326_s13  ;;  %s75_s30 = sadd.s32 1, %s3318_s11 }
  0x11   : > { %p3046_p10 = pnand %p3045_p9, %p3390_p1  ;;  %p36_p12 = scmp.ge.s32.totalorder %s34_s29, 2 }
  0x12   : > { %p82_p13 = scmp.ne.s32.totalorder %s3318_s11, %s3314_s10  ;;  %p83_p0 = scmp.eq.s32.totalorder %s3330_s14, 0 }
  0x13   : > { %3048 = dma.hbm_to_vmem [thread:$0]  (!%p3046_p10), %s145_s23, 16384, %s147_s26, [#allocation4], %s3333_s27, %s3333_s27, %s3334_s28  }
  0x14   : > { %s4170_s29 = smov (%p36_p12, %s34_s29), 0  ;;  %p84_p3 = por %p83_p0, %p82_p13 }
  0x15   : > { %p3431_p5 = por %p3394_p2, %p82_p13  ;;  %s71_s4 = ssub.s32 %s3326_s13, %s4170_s29 }
  0x16   : > { %p3058_p7 = scmp.lt.s32.totalorder %s3330_s14, 2  ;;  %p73_p9 = scmp.eq.s32.totalorder %s71_s4, 0 }
  0x17   : > { %s160_s5 = sand.u32 1, %s3318_s11   ;;  %s3000_s8 = smul.u32 24, %s3326_s13 }
  0x18   : > { %s3034_s6 = smul.u32 768, %s160_s5  ;;  %p3050_p10 = pnand %p3058_p7, %p84_p3 }
  0x19   : > { %s3440_s7 = scalar_select %p73_p9, %s3318_s11, %s75_s30  }
  0x1a   : > { %s164_s15 = scalar_lea.vmem [#allocation6], %s3034_s6  ;;  %s172_s23 = scalar_lea.hbm %s4112_s1, %s3000_s8 }
  0x1b   : > { %s175_s16 = sshll.u32 %s164_s15, 4  ;;  %s173_s18 = sshll.u32 %s172_s23, 4  ;;  %s176_s16 = int_to_ptr.vmem [resolvable:$true] %s175_s16  ;;  %s174_s18 = int_to_ptr.hbm [resolvable:$true] %s173_s18 }
  0x1c   : > { %s161_s25 = scalar_lea.sflag [#allocation7], %s160_s5  ;;  %s3335_s26 = smov 768  }
  0x1d   : > { %s3336_s27 = smov 384   ;;  %s3337_s28 = smov 24  }
  0x1e   : > { %3052 = dma.hbm_to_vmem [thread:$0]  (!%p3050_p10), %s174_s18, 12288, %s176_s16, %s161_s25, %s3335_s26, %s3336_s27, %s3337_s28  }
  0x1f   : > { %187 = sbr.rel (%p3413_p8) target bundleno = 974 (0x3ce), region = 28 }
  0x24   : > { %3297 = dma.done.wait (%p3390_p1), [#allocation4], 16384  }
  0x25   : > { %3299 = vsyncadd (%p3390_p1), [#allocation4], 4294950912  ;;  %s3453_s30 = sand.u32 1, %s3314_s10  }
  0x26   : > { %s3035_s4 = smul.u32 768, %s3453_s30  ;;  %s195_s5 = scalar_lea.sflag [#allocation7], %s3453_s30 }
  0x28   : > { %s3457_s6 = scalar_lea.vmem [#allocation6], %s3035_s4 }
  0x29   : > { %3301 = dma.done.wait (%p3400_p4), %s195_s5, 12288  }
  0x2a   : > { %3303 = vsyncadd (%p3400_p4), %s195_s5, 4294955008  ;;  %v787_v0 = vld [vmem:[%s3457_s6 + $0x168] sm:$0xff]  ;;  %v784_v2 = vld [vmem:[%s3457_s6 + $0x150] sm:$0xff]  ;;  %s3036_s17 = smul.u32 1536, %s3453_s30  ;;  %s3264_s27 = scalar_lea.hbm %s4113_s2, 3072 }
  0x2b   : > { %v835_v1 = vld [vmem:[%s3457_s6 + $0x2e8] sm:$0xff]  ;;  %3002 = vmatpush.msra.mxu2 %v787_v0  ;;  %v832_v3 = vld [vmem:[%s3457_s6 + $0x2d0] sm:$0xff]  ;;  %v781_v4 = vld [vmem:[%s3457_s6 + $0x138] sm:$0xff]  ;;  %838 = vmatpush.msra.mxu0 %v787_v0  ;;  %s3001_s24 = smul.u32 24, %s3322_s12  ;;  %s2864_s12 = scalar_lea.sflag [#allocation5], %s3453_s30 }
  0x2c   : > { %3018 = vmatpush.msra.mxu3 %v835_v1  ;;  %v829_v5 = vld [vmem:[%s3457_s6 + $0x2b8] sm:$0xff]  ;;  %1047 = vmatpush.msra.mxu1 %v835_v1  ;;  %v778_v6 = vld [vmem:[%s3457_s6 + $0x120] sm:$0xff]  ;;  %v775_v8 = vld [vmem:[%s3457_s6 + $0x108] sm:$0xff]  ;;  %s3638_s19 = scalar_lea.vmem [#allocation8], %s3036_s17 }
  0x2d   : > { %3003 = vmatpush.msra.mxu2 %v784_v2  ;;  %v826_v7 = vld [vmem:[%s3457_s6 + $0x2a0] sm:$0xff]  ;;  %839 = vmatpush.msra.mxu0 %v784_v2  ;;  %v823_v9 = vld [vmem:[%s3457_s6 + $0x288] sm:$0xff]  ;;  %v772_v10 = vld [vmem:[%s3457_s6 + $0xf0] sm:$0xff]  ;;  %s2878_s16 = scalar_lea.hbm %s4113_s2, %s3001_s24  ;;  %s2879_s21 = sshll.u32 %s3638_s19, 4  ;;  %s2880_s21 = int_to_ptr.vmem [resolvable:$true] %s2879_s21 }
  0x2e   : > { %3019 = vmatpush.msra.mxu3 %v832_v3  ;;  %1048 = vmatpush.msra.mxu1 %v832_v3  ;;  %v820_v11 = vld [vmem:[%s3457_s6 + $0x270] sm:$0xff]  ;;  %v769_v12 = vld [vmem:[%s3457_s6 + $0xd8] sm:$0xff]  ;;  %v766_v14 = vld [vmem:[%s3457_s6 + $0xc0] sm:$0xff]  ;;  %s2881_s22 = sshll.u32 %s2878_s16, 4  ;;  %s2882_s22 = int_to_ptr.hbm [resolvable:$true] %s2881_s22 }
  0x2f   : > { %3004 = vmatpush.msra.mxu2 %v781_v4  ;;  %840 = vmatpush.msra.mxu0 %v781_v4  ;;  %v817_v13 = vld [vmem:[%s3457_s6 + $0x258] sm:$0xff]  ;;  %v814_v15 = vld [vmem:[%s3457_s6 + $0x240] sm:$0xff]  ;;  %v763_v16 = vld [vmem:[%s3457_s6 + $0xa8] sm:$0xff]  ;;  %s3258_s23 = sshra.s32 %s2882_s22, 4  ;;  %s3259_s23 = int_to_ptr.hbm [resolvable:$true] %s3258_s23 }
  0x30   : > { %3020 = vmatpush.msra.mxu3 %v829_v5  ;;  %1049 = vmatpush.msra.mxu1 %v829_v5  ;;  %v811_v17 = vld [vmem:[%s3457_s6 + $0x228] sm:$0xff]  ;;  %v760_v18 = vld [vmem:[%s3457_s6 + $0x90] sm:$0xff]  ;;  %v757_v20 = vld [vmem:[%s3457_s6 + $0x78] sm:$0xff]  ;;  %s3260_s18 = scalar_lea.hbm %s3259_s23, 1536  ;;  %p3265_p8 = scmp.lt.s32.totalorder %s3259_s23, %s4113_s2 }
  0x31   : > { %3005 = vmatpush.msra.mxu2 %v778_v6  ;;  %841 = vmatpush.msra.mxu0 %v778_v6  ;;  %v808_v19 = vld [vmem:[%s3457_s6 + $0x210] sm:$0xff]  ;;  %v805_v21 = vld [vmem:[%s3457_s6 + $0x1f8] sm:$0xff]  ;;  %v754_v22 = vld [vmem:[%s3457_s6 + $0x60] sm:$0xff]  ;;  %p3261_p1 = scmp.ne.s32.totalorder %s3259_s23, %s3260_s18  ;;  %p3266_p12 = scmp.lt.s32.totalorder %s3264_s27, %s3260_s18 }
  0x32   : > { %3021 = vmatpush.msra.mxu3 %v826_v7  ;;  %1050 = vmatpush.msra.mxu1 %v826_v7  ;;  %v802_v23 = vld [vmem:[%s3457_s6 + $0x1e0] sm:$0xff]  ;;  %v751_v24 = vld [vmem:[%s3457_s6 + $0x48] sm:$0xff]  ;;  %v748_v26 = vld [vmem:[%s3457_s6 + $0x30] sm:$0xff] }
  0x33   : > { %3006 = vmatpush.msra.mxu2 %v775_v8  ;;  %842 = vmatpush.msra.mxu0 %v775_v8  ;;  %v799_v25 = vld [vmem:[%s3457_s6 + $0x1c8] sm:$0xff]  ;;  %v796_v27 = vld [vmem:[%s3457_s6 + $0x1b0] sm:$0xff]  ;;  %v745_v28 = vld [vmem:[%s3457_s6 + $0x18] sm:$0xff]  ;;  %p3262_p2 = pnand %p3261_p1, %p3431_p5  ;;  %p3267_p13 = por %p3266_p12, %p3265_p8 }
  0x34   : > { %3022 = vmatpush.msra.mxu3 %v823_v9  ;;  %1051 = vmatpush.msra.mxu1 %v823_v9  ;;  %v793_v29 = vld [vmem:[%s3457_s6 + $0x198] sm:$0xff]  ;;  %v742_v30 = vld [vmem:[%s3457_s6] sm:$0xff]  ;;  %v679_v33 = vld [vmem:[#allocation3 + $0x208] sm:$0xff] }
  0x35   : > { %3007 = vmatpush.msra.mxu2 %v772_v10  ;;  %843 = vmatpush.msra.mxu0 %v772_v10  ;;  %v790_v31 = vld [vmem:[%s3457_s6 + $0x180] sm:$0xff]  ;;  %v788_v34 = vld [vmem:[%s3457_s6 + $0x170] sm:$0xff]  ;;  %v3499_v37 = vld [vmem:[#allocation3 + $0x8] sm:$0xff]  ;;  %p3263_p4 = pneg %p3262_p2 }
  0x36   : > { %3023 = vmatpush.msra.mxu3 %v820_v11  ;;  %1052 = vmatpush.msra.mxu1 %v820_v11  ;;  %v678_v32 = vld [vmem:[#allocation3 + $0x200] sm:$0xff]  ;;  %v836_v35 = vld [vmem:[%s3457_s6 + $0x2f0] sm:$0xff]  ;;  %v789_v38 = vld [vmem:[%s3457_s6 + $0x178] sm:$0xff] }
  0x37   : > { %3008 = vmatpush.msra.mxu2 %v769_v12  ;;  %844 = vmatpush.msra.mxu0 %v769_v12  ;;  %v3497_v36 = vld [vmem:[#allocation3] sm:$0xff]  ;;  %v837_v39 = vld [vmem:[%s3457_s6 + $0x2f8] sm:$0xff]  ;;  %v680_v46 = vld [vmem:[#allocation3 + $0x210] sm:$0xff]  ;;  %p3268_p0 = pnand %p3267_p13, %p3263_p4 }
  0x38   : > { %3024 = vmatpush.msra.mxu3 %v817_v13  ;;  %1053 = vmatpush.msra.mxu1 %v817_v13  ;;  %v785_v40 = vld [vmem:[%s3457_s6 + $0x158] sm:$0xff]  ;;  %v786_v42 = vld [vmem:[%s3457_s6 + $0x160] sm:$0xff]  ;;  %v783_v48 = vld [vmem:[%s3457_s6 + $0x148] sm:$0xff] }
  0x39   : > { %3009 = vmatpush.msra.mxu2 %v766_v14  ;;  %845 = vmatpush.msra.mxu0 %v766_v14  ;;  %v833_v41 = vld [vmem:[%s3457_s6 + $0x2d8] sm:$0xff]  ;;  %v834_v43 = vld [vmem:[%s3457_s6 + $0x2e0] sm:$0xff]  ;;  %v831_v49 = vld [vmem:[%s3457_s6 + $0x2c8] sm:$0xff] }
  0x3a   : > { %3025 = vmatpush.msra.mxu3 %v814_v15  ;;  %1054 = vmatpush.msra.mxu1 %v814_v15  ;;  %v782_v44 = vld [vmem:[%s3457_s6 + $0x140] sm:$0xff]  ;;  %v681_v47 = vld [vmem:[#allocation3 + $0x218] sm:$0xff]  ;;  %v3513_v50 = vld [vmem:[#allocation3 + $0x10] sm:$0xff] }
  0x3b   : > { %3010 = vmatpush.msra.mxu2 %v763_v16  ;;  %846 = vmatpush.msra.mxu0 %v763_v16  ;;  %v830_v45 = vld [vmem:[%s3457_s6 + $0x2c0] sm:$0xff]  ;;  %v3515_v51 = vld [vmem:[#allocation3 + $0x18] sm:$0xff]  ;;  %v683_v53 = vld [vmem:[#allocation3 + $0x228] sm:$0xff] }
  0x3c   : > { %3026 = vmatpush.msra.mxu3 %v811_v17  ;;  %1055 = vmatpush.msra.mxu1 %v811_v17  ;;  %v682_v52 = vld [vmem:[#allocation3 + $0x220] sm:$0xff]  ;;  %v3521_v55 = vld [vmem:[#allocation3 + $0x28] sm:$0xff]  ;;  %v780_v58 = vld [vmem:[%s3457_s6 + $0x130] sm:$0xff] }
  0x3d   : > { %3011 = vmatpush.msra.mxu2 %v760_v18  ;;  %847 = vmatpush.msra.mxu0 %v760_v18  ;;  %v3519_v54 = vld [vmem:[#allocation3 + $0x20] sm:$0xff]  ;;  %v779_v56 = vld [vmem:[%s3457_s6 + $0x128] sm:$0xff]  ;;  %v828_v59 = vld [vmem:[%s3457_s6 + $0x2b0] sm:$0xff] }
  0x3e   : > { %3027 = vmatpush.msra.mxu3 %v808_v19  ;;  %1056 = vmatpush.msra.mxu1 %v808_v19  ;;  %v827_v57 = vld [vmem:[%s3457_s6 + $0x2a8] sm:$0xff]  ;;  %v684_v60 = vld [vmem:[#allocation3 + $0x230] sm:$0xff]  ;;  %v685_v61 = vld [vmem:[#allocation3 + $0x238] sm:$0xff] }
  0x3f   : > { %3012 = vmatpush.msra.mxu2 %v757_v20  ;;  %848 = vmatpush.msra.mxu0 %v757_v20  ;;  %v3529_v62 = vld [vmem:[#allocation3 + $0x30] sm:$0xff]  ;;  %v3531_v63 = vld [vmem:[#allocation3 + $0x38] sm:$0xff]  ;;  %v686_v0 = vld [vmem:[#allocation3 + $0x240] sm:$0xff] }
  0x40   : > { %3028 = vmatpush.msra.mxu3 %v805_v21  ;;  %1057 = vmatpush.msra.mxu1 %v805_v21  ;;  %v687_v1 = vld [vmem:[#allocation3 + $0x248] sm:$0xff]  ;;  %v3535_v2 = vld [vmem:[#allocation3 + $0x40] sm:$0xff]  ;;  %v776_v4 = vld [vmem:[%s3457_s6 + $0x110] sm:$0xff] }
  0x41   : > { %3013 = vmatpush.msra.mxu2 %v754_v22  ;;  %849 = vmatpush.msra.mxu0 %v754_v22  ;;  %v3537_v3 = vld [vmem:[#allocation3 + $0x48] sm:$0xff]  ;;  %v824_v5 = vld [vmem:[%s3457_s6 + $0x290] sm:$0xff]  ;;  %v777_v6 = vld [vmem:[%s3457_s6 + $0x118] sm:$0xff] }
  0x42   : > { %3029 = vmatpush.msra.mxu3 %v802_v23  ;;  %1058 = vmatpush.msra.mxu1 %v802_v23  ;;  %v825_v7 = vld [vmem:[%s3457_s6 + $0x298] sm:$0xff]  ;;  %v688_v8 = vld [vmem:[#allocation3 + $0x250] sm:$0xff]  ;;  %v690_v12 = vld [vmem:[#allocation3 + $0x260] sm:$0xff] }
  0x43   : > { %3014 = vmatpush.msra.mxu2 %v751_v24  ;;  %850 = vmatpush.msra.mxu0 %v751_v24  ;;  %v689_v9 = vld [vmem:[#allocation3 + $0x258] sm:$0xff]  ;;  %v3545_v10 = vld [vmem:[#allocation3 + $0x50] sm:$0xff]  ;;  %v691_v13 = vld [vmem:[#allocation3 + $0x268] sm:$0xff] }
  0x44   : > { %3030 = vmatpush.msra.mxu3 %v799_v25  ;;  %1059 = vmatpush.msra.mxu1 %v799_v25  ;;  %v3547_v11 = vld [vmem:[#allocation3 + $0x58] sm:$0xff]  ;;  %v3551_v14 = vld [vmem:[#allocation3 + $0x60] sm:$0xff]  ;;  %v3553_v15 = vld [vmem:[#allocation3 + $0x68] sm:$0xff] }
  0x45   : > { %3015 = vmatpush.msra.mxu2 %v748_v26  ;;  %851 = vmatpush.msra.mxu0 %v748_v26  ;;  %v773_v16 = vld [vmem:[%s3457_s6 + $0xf8] sm:$0xff]  ;;  %v774_v18 = vld [vmem:[%s3457_s6 + $0x100] sm:$0xff]  ;;  %v692_v20 = vld [vmem:[#allocation3 + $0x270] sm:$0xff] }
  0x46   : > { %3031 = vmatpush.msra.mxu3 %v796_v27  ;;  %1060 = vmatpush.msra.mxu1 %v796_v27  ;;  %v821_v17 = vld [vmem:[%s3457_s6 + $0x278] sm:$0xff]  ;;  %v822_v19 = vld [vmem:[%s3457_s6 + $0x280] sm:$0xff]  ;;  %v3561_v22 = vld [vmem:[#allocation3 + $0x70] sm:$0xff] }
  0x47   : > { %3016 = vmatpush.msra.mxu2 %v745_v28  ;;  %852 = vmatpush.msra.mxu0 %v745_v28  ;;  %v693_v21 = vld [vmem:[#allocation3 + $0x278] sm:$0xff]  ;;  %v694_v24 = vld [vmem:[#allocation3 + $0x280] sm:$0xff]  ;;  %v695_v25 = vld [vmem:[#allocation3 + $0x288] sm:$0xff] }
  0x48   : > { %3032 = vmatpush.msra.mxu3 %v793_v29  ;;  %1061 = vmatpush.msra.mxu1 %v793_v29  ;;  %v3563_v23 = vld [vmem:[#allocation3 + $0x78] sm:$0xff]  ;;  %v3567_v26 = vld [vmem:[#allocation3 + $0x80] sm:$0xff]  ;;  %v3569_v27 = vld [vmem:[#allocation3 + $0x88] sm:$0xff] }
  0x49   : > { %3017 = vmatpush.msra.mxu2 %v742_v30  ;;  %853 = vmatpush.msra.mxu0 %v742_v30  ;;  %v770_v28 = vld [vmem:[%s3457_s6 + $0xe0] sm:$0xff]  ;;  %v771_v30 = vld [vmem:[%s3457_s6 + $0xe8] sm:$0xff] }
  0x4a   : > { %3033 = vmatpush.msra.mxu3 %v790_v31  ;;  %950 = vmatmul.f32.vlgmr.msra.gmra.mxu2 %v678_v32  ;;  %v818_v29 = vld [vmem:[%s3457_s6 + $0x260] sm:$0xff]  ;;  %v696_v32 = vld [vmem:[#allocation3 + $0x290] sm:$0xff] }
  0x4b   : > { %1159 = vmatmul.f32.vlgmr.msra.gmra.mxu3 %v679_v33  ;;  %1256 = vmatpush.msrb.mxu2 %v788_v34  ;;  %v697_v33 = vld [vmem:[#allocation3 + $0x298] sm:$0xff]  ;;  %v3577_v34 = vld [vmem:[#allocation3 + $0x90] sm:$0xff] }
  0x4c   : > { %1465 = vmatpush.msrb.mxu3 %v836_v35  ;;  %1062 = vmatpush.msra.mxu1 %v790_v31  ;;  %v819_v31 = vld [vmem:[%s3457_s6 + $0x268] sm:$0xff]  ;;  %v3579_v35 = vld [vmem:[#allocation3 + $0x98] sm:$0xff] }
  0x4d   : > { %854 = vmatmul.f32.vlgmr.msra.gmra.mxu0 %v3497_v36  ;;  %1063 = vmatmul.f32.vlgmr.msra.gmra.mxu1 %v3499_v37 }
  0x4e   : > { %1674 = vmatpush.msrb.mxu0 %v789_v38  ;;  %1883 = vmatpush.msrb.mxu1 %v837_v39  ;;  %v698_v38 = vld [vmem:[#allocation3 + $0x2a0] sm:$0xff]  ;;  %v699_v39 = vld [vmem:[#allocation3 + $0x2a8] sm:$0xff] }
  0x4f   : > { %1257 = vmatpush.msrb.mxu2 %v785_v40  ;;  %1466 = vmatpush.msrb.mxu3 %v833_v41  ;;  %v3583_v40 = vld [vmem:[#allocation3 + $0xa0] sm:$0xff]  ;;  %v3585_v41 = vld [vmem:[#allocation3 + $0xa8] sm:$0xff] }
  0x50   : > { %1675 = vmatpush.msrb.mxu0 %v786_v42  ;;  %1884 = vmatpush.msrb.mxu1 %v834_v43  ;;  %v767_v42 = vld [vmem:[%s3457_s6 + $0xc8] sm:$0xff] }
  0x51   : > { %1258 = vmatpush.msrb.mxu2 %v782_v44  ;;  %1467 = vmatpush.msrb.mxu3 %v830_v45  ;;  %v815_v43 = vld [vmem:[%s3457_s6 + $0x248] sm:$0xff]  ;;  %v768_v44 = vld [vmem:[%s3457_s6 + $0xd0] sm:$0xff] }
  0x52   : > { %953 = vmatmul.f32.gmra.mxu2 %v680_v46  ;;  %1676 = vmatpush.msrb.mxu0 %v783_v48  ;;  %v816_v45 = vld [vmem:[%s3457_s6 + $0x250] sm:$0xff] }
  0x53   : > { %1162 = vmatmul.f32.gmra.mxu3 %v681_v47  ;;  %1885 = vmatpush.msrb.mxu1 %v831_v49  ;;  %v700_v46 = vld [vmem:[#allocation3 + $0x2b0] sm:$0xff]  ;;  %v701_v47 = vld [vmem:[#allocation3 + $0x2b8] sm:$0xff] }
  0x54   : > { %1259 = vmatpush.msrb.mxu2 %v779_v56  ;;  %1468 = vmatpush.msrb.mxu3 %v827_v57  ;;  %v3593_v48 = vld [vmem:[#allocation3 + $0xb0] sm:$0xff]  ;;  %v3595_v49 = vld [vmem:[#allocation3 + $0xb8] sm:$0xff]  ;;  %v3599_v56 = vld [vmem:[#allocation3 + $0xc0] sm:$0xff] }
  0x55   : > { %857 = vmatmul.f32.gmra.mxu0 %v3513_v50  ;;  %1066 = vmatmul.f32.gmra.mxu1 %v3515_v51  ;;  %v3601_v57 = vld [vmem:[#allocation3 + $0xc8] sm:$0xff] }
  0x56   : > { %1677 = vmatpush.msrb.mxu0 %v780_v58  ;;  %1886 = vmatpush.msrb.mxu1 %v828_v59  ;;  %v764_v58 = vld [vmem:[%s3457_s6 + $0xb0] sm:$0xff] }
  0x57   : > { %1260 = vmatpush.msrb.mxu2 %v776_v4  ;;  %1469 = vmatpush.msrb.mxu3 %v824_v5  ;;  %v812_v59 = vld [vmem:[%s3457_s6 + $0x230] sm:$0xff]  ;;  %v3611_v5 = vld [vmem:[#allocation3 + $0xd8] sm:$0xff] }
  0x58   : > { %1678 = vmatpush.msrb.mxu0 %v777_v6  ;;  %1887 = vmatpush.msrb.mxu1 %v825_v7  ;;  %v3609_v4 = vld [vmem:[#allocation3 + $0xd0] sm:$0xff]  ;;  %v706_v6 = vld [vmem:[#allocation3 + $0x2e0] sm:$0xff]  ;;  %v707_v7 = vld [vmem:[#allocation3 + $0x2e8] sm:$0xff] }
  0x59   : > { %1261 = vmatpush.msrb.mxu2 %v773_v16  ;;  %1470 = vmatpush.msrb.mxu3 %v821_v17  ;;  %v708_v16 = vld [vmem:[#allocation3 + $0x2f0] sm:$0xff]  ;;  %v709_v17 = vld [vmem:[#allocation3 + $0x2f8] sm:$0xff] }
  0x5a   : > { %956 = vmatmul.f32.gmra.mxu2 %v682_v52  ;;  %1679 = vmatpush.msrb.mxu0 %v774_v18  ;;  %v702_v52 = vld [vmem:[#allocation3 + $0x2c0] sm:$0xff] }
  0x5b   : > { %1165 = vmatmul.f32.gmra.mxu3 %v683_v53  ;;  %1888 = vmatpush.msrb.mxu1 %v822_v19  ;;  %v703_v53 = vld [vmem:[#allocation3 + $0x2c8] sm:$0xff]  ;;  %v762_v18 = vld [vmem:[%s3457_s6 + $0xa0] sm:$0xff] }
  0x5c   : > { %1262 = vmatpush.msrb.mxu2 %v770_v28  ;;  %1471 = vmatpush.msrb.mxu3 %v818_v29  ;;  %v810_v19 = vld [vmem:[%s3457_s6 + $0x220] sm:$0xff] }
  0x5d   : > { %860 = vmatmul.f32.gmra.mxu0 %v3519_v54  ;;  %1069 = vmatmul.f32.gmra.mxu1 %v3521_v55  ;;  %v3632_v28 = vld [vmem:[#allocation3 + $0x100] sm:$0xff] }
  0x5e   : > { %1680 = vmatpush.msrb.mxu0 %v771_v30  ;;  %1889 = vmatpush.msrb.mxu1 %v819_v31  ;;  %v3634_v31 = vld [vmem:[#allocation3 + $0x108] sm:$0xff] }
  0x5f   : > { %1263 = vmatpush.msrb.mxu2 %v767_v42  ;;  %1472 = vmatpush.msrb.mxu3 %v815_v43 }
  0x60   : > { %1681 = vmatpush.msrb.mxu0 %v768_v44  ;;  %1890 = vmatpush.msrb.mxu1 %v816_v45  ;;  %v712_v44 = vld [vmem:[#allocation3 + $0x310] sm:$0xff]  ;;  %v713_v45 = vld [vmem:[#allocation3 + $0x318] sm:$0xff] }
  0x61   : > { %1264 = vmatpush.msrb.mxu2 %v764_v58  ;;  %1473 = vmatpush.msrb.mxu3 %v812_v59  ;;  %v3646_v58 = vld [vmem:[#allocation3 + $0x110] sm:$0xff]  ;;  %v3648_v59 = vld [vmem:[#allocation3 + $0x118] sm:$0xff] }
  0x62   : > { %959 = vmatmul.f32.gmra.mxu2 %v684_v60  ;;  %v704_v60 = vld [vmem:[#allocation3 + $0x2d0] sm:$0xff] }
  0x63   : > { %1168 = vmatmul.f32.gmra.mxu3 %v685_v61  ;;  %v705_v61 = vld [vmem:[#allocation3 + $0x2d8] sm:$0xff] }
  0x65   : > { %863 = vmatmul.f32.gmra.mxu0 %v3529_v62  ;;  %1072 = vmatmul.f32.gmra.mxu1 %v3531_v63 }
  0x6a   : > { %962 = vmatmul.f32.gmra.mxu2 %v686_v0  ;;  %v765_v0 = vld [vmem:[%s3457_s6 + $0xb8] sm:$0xff] }
  0x6b   : > { %1171 = vmatmul.f32.gmra.mxu3 %v687_v1  ;;  %v813_v1 = vld [vmem:[%s3457_s6 + $0x238] sm:$0xff]  ;;  %1682 = vmatpush.msrb.mxu0 %v765_v0 }
  0x6c   : > { %1891 = vmatpush.msrb.mxu1 %v813_v1 }
  0x6d   : > { %866 = vmatmul.f32.gmra.mxu0 %v3535_v2  ;;  %1075 = vmatmul.f32.gmra.mxu1 %v3537_v3 }
  0x6e   : > { %1683 = vmatpush.msrb.mxu0 %v762_v18  ;;  %1892 = vmatpush.msrb.mxu1 %v810_v19  ;;  %v755_v18 = vld [vmem:[%s3457_s6 + $0x68] sm:$0xff] }
  0x6f   : > { %v803_v19 = vld [vmem:[%s3457_s6 + $0x1e8] sm:$0xff] }
  0x72   : > { %965 = vmatmul.f32.gmra.mxu2 %v688_v8  ;;  %v3615_v8 = vld [vmem:[#allocation3 + $0xe0] sm:$0xff] }
  0x73   : > { %1174 = vmatmul.f32.gmra.mxu3 %v689_v9  ;;  %v3617_v9 = vld [vmem:[#allocation3 + $0xe8] sm:$0xff] }
  0x75   : > { %869 = vmatmul.f32.gmra.mxu0 %v3545_v10  ;;  %1078 = vmatmul.f32.gmra.mxu1 %v3547_v11 }
  0x7a   : > { %968 = vmatmul.f32.gmra.mxu2 %v690_v12  ;;  %v761_v12 = vld [vmem:[%s3457_s6 + $0x98] sm:$0xff] }
  0x7b   : > { %1177 = vmatmul.f32.gmra.mxu3 %v691_v13  ;;  %v809_v13 = vld [vmem:[%s3457_s6 + $0x218] sm:$0xff]  ;;  %1265 = vmatpush.msrb.mxu2 %v761_v12  ;;  %v3654_v12 = vld [vmem:[#allocation3 + $0x120] sm:$0xff] }
  0x7c   : > { %1474 = vmatpush.msrb.mxu3 %v809_v13 }
  0x7d   : > { %872 = vmatmul.f32.gmra.mxu0 %v3551_v14  ;;  %1081 = vmatmul.f32.gmra.mxu1 %v3553_v15 }
  0x82   : > { %971 = vmatmul.f32.gmra.mxu2 %v692_v20  ;;  %v3625_v20 = vld [vmem:[#allocation3 + $0xf0] sm:$0xff] }
  0x83   : > { %1180 = vmatmul.f32.gmra.mxu3 %v693_v21  ;;  %v3627_v21 = vld [vmem:[#allocation3 + $0xf8] sm:$0xff] }
  0x85   : > { %875 = vmatmul.f32.gmra.mxu0 %v3561_v22  ;;  %1084 = vmatmul.f32.gmra.mxu1 %v3563_v23 }
  0x8a   : > { %974 = vmatmul.f32.gmra.mxu2 %v694_v24  ;;  %v710_v24 = vld [vmem:[#allocation3 + $0x300] sm:$0xff] }
  0x8b   : > { %1183 = vmatmul.f32.gmra.mxu3 %v695_v25  ;;  %v711_v25 = vld [vmem:[#allocation3 + $0x308] sm:$0xff] }
  0x8d   : > { %878 = vmatmul.f32.gmra.mxu0 %v3567_v26  ;;  %1087 = vmatmul.f32.gmra.mxu1 %v3569_v27 }
  0x92   : > { %977 = vmatmul.f32.gmra.mxu2 %v696_v32  ;;  %v758_v32 = vld [vmem:[%s3457_s6 + $0x80] sm:$0xff] }
  0x93   : > { %1186 = vmatmul.f32.gmra.mxu3 %v697_v33  ;;  %v806_v33 = vld [vmem:[%s3457_s6 + $0x200] sm:$0xff]  ;;  %1266 = vmatpush.msrb.mxu2 %v758_v32  ;;  %v716_v32 = vld [vmem:[#allocation3 + $0x330] sm:$0xff] }
  0x94   : > { %1475 = vmatpush.msrb.mxu3 %v806_v33  ;;  %v717_v33 = vld [vmem:[#allocation3 + $0x338] sm:$0xff] }
  0x95   : > { %881 = vmatmul.f32.gmra.mxu0 %v3577_v34  ;;  %1090 = vmatmul.f32.gmra.mxu1 %v3579_v35 }
  0x96   : > { %1267 = vmatpush.msrb.mxu2 %v755_v18  ;;  %1476 = vmatpush.msrb.mxu3 %v803_v19 }
  0x9a   : > { %980 = vmatmul.f32.gmra.mxu2 %v698_v38 }
  0x9b   : > { %1189 = vmatmul.f32.gmra.mxu3 %v699_v39 }
  0x9d   : > { %884 = vmatmul.f32.gmra.mxu0 %v3583_v40  ;;  %1093 = vmatmul.f32.gmra.mxu1 %v3585_v41 }
  0xa2   : > { %983 = vmatmul.f32.gmra.mxu2 %v700_v46  ;;  %v759_v46 = vld [vmem:[%s3457_s6 + $0x88] sm:$0xff] }
  0xa3   : > { %1192 = vmatmul.f32.gmra.mxu3 %v701_v47  ;;  %v807_v47 = vld [vmem:[%s3457_s6 + $0x208] sm:$0xff]  ;;  %1684 = vmatpush.msrb.mxu0 %v759_v46 }
  0xa4   : > { %1893 = vmatpush.msrb.mxu1 %v807_v47 }
  0xa5   : > { %887 = vmatmul.f32.gmra.mxu0 %v3593_v48  ;;  %1096 = vmatmul.f32.gmra.mxu1 %v3595_v49 }
  0xaa   : > { %986 = vmatmul.f32.gmra.mxu2 %v702_v52 }
  0xab   : > { %1195 = vmatmul.f32.gmra.mxu3 %v703_v53 }
  0xad   : > { %890 = vmatmul.f32.gmra.mxu0 %v3599_v56  ;;  %1099 = vmatmul.f32.gmra.mxu1 %v3601_v57 }
  0xb2   : > { %989 = vmatmul.f32.gmra.mxu2 %v704_v60 }
  0xb3   : > { %1198 = vmatmul.f32.gmra.mxu3 %v705_v61 }
  0xb5   : > { %893 = vmatmul.f32.gmra.mxu0 %v3609_v4  ;;  %1102 = vmatmul.f32.gmra.mxu1 %v3611_v5 }
  0xba   : > { %992 = vmatmul.f32.gmra.mxu2 %v706_v6  ;;  %v714_v6 = vld [vmem:[#allocation3 + $0x320] sm:$0xff] }
  0xbb   : > { %1201 = vmatmul.f32.gmra.mxu3 %v707_v7  ;;  %v715_v7 = vld [vmem:[#allocation3 + $0x328] sm:$0xff] }
  0xbd   : > { %896 = vmatmul.f32.gmra.mxu0 %v3615_v8  ;;  %1105 = vmatmul.f32.gmra.mxu1 %v3617_v9 }
  0xc2   : > { %995 = vmatmul.f32.gmra.mxu2 %v708_v16 }
  0xc3   : > { %1204 = vmatmul.f32.gmra.mxu3 %v709_v17  ;;  %v3656_v17 = vld [vmem:[#allocation3 + $0x128] sm:$0xff] }
  0xc5   : > { %899 = vmatmul.f32.gmra.mxu0 %v3625_v20  ;;  %1108 = vmatmul.f32.gmra.mxu1 %v3627_v21 }
  0xca   : > { %998 = vmatmul.f32.gmra.mxu2 %v710_v24  ;;  %v855_v29 = vpop.f32.mrf.mxu0  ;;  %v1064_v30 = vpop.f32.mrf.mxu1 }
  0xcb   : > { %1207 = vmatmul.f32.gmra.mxu3 %v711_v25  ;;  %v1065_v38 = vadd.f32 %v1064_v30, %v855_v29 }
  0xcd   : > { %v951_v39 = vpop.f32.mrf.mxu2  ;;  %2671 = vst [vmem:[%s3638_s19] sm:$0xff] %v1065_v38  ;;  %902 = vmatmul.f32.gmra.mxu0 %v3632_v28  ;;  %1111 = vmatmul.f32.gmra.mxu1 %v3634_v31  ;;  %v756_v38 = vld [vmem:[%s3457_s6 + $0x70] sm:$0xff] }
  0xce   : > { %v1160_v42 = vpop.f32.mrf.mxu3  ;;  %1685 = vmatpush.msrb.mxu0 %v756_v38 }
  0xcf   : > { %v1161_v43 = vadd.f32 %v1160_v42, %v951_v39  ;;  %v804_v39 = vld [vmem:[%s3457_s6 + $0x1f0] sm:$0xff] }
  0xd0   : > { %1894 = vmatpush.msrb.mxu1 %v804_v39 }
  0xd1   : > { %2767 = vst [vmem:[%s3638_s19 + $0x300] sm:$0xff] %v1161_v43 }
  0xd2   : > { %1001 = vmatmul.f32.gmra.mxu2 %v712_v44  ;;  %v858_v52 = vpop.f32.mrf.mxu0  ;;  %v1067_v53 = vpop.f32.mrf.mxu1  ;;  %v3666_v44 = vld [vmem:[#allocation3 + $0x130] sm:$0xff] }
  0xd3   : > { %1210 = vmatmul.f32.gmra.mxu3 %v713_v45  ;;  %v1068_v60 = vadd.f32 %v1067_v53, %v858_v52  ;;  %v3668_v45 = vld [vmem:[#allocation3 + $0x138] sm:$0xff] }
  0xd5   : > { %v954_v61 = vpop.f32.mrf.mxu2  ;;  %2674 = vst [vmem:[%s3638_s19 + $0x18] sm:$0xff] %v1068_v60  ;;  %905 = vmatmul.f32.gmra.mxu0 %v3646_v58  ;;  %1114 = vmatmul.f32.gmra.mxu1 %v3648_v59  ;;  %v718_v60 = vld [vmem:[#allocation3 + $0x340] sm:$0xff] }
  0xd6   : > { %v1163_v0 = vpop.f32.mrf.mxu3 }
  0xd7   : > { %v1164_v1 = vadd.f32 %v1163_v0, %v954_v61  ;;  %v719_v61 = vld [vmem:[#allocation3 + $0x348] sm:$0xff]  ;;  %v3674_v0 = vld [vmem:[#allocation3 + $0x140] sm:$0xff] }
  0xd9   : > { %2770 = vst [vmem:[%s3638_s19 + $0x318] sm:$0xff] %v1164_v1 }
  0xda   : > { %1004 = vmatmul.f32.gmra.mxu2 %v714_v6  ;;  %v861_v13 = vpop.f32.mrf.mxu0  ;;  %v1070_v16 = vpop.f32.mrf.mxu1 }
  0xdb   : > { %1213 = vmatmul.f32.gmra.mxu3 %v715_v7  ;;  %v1071_v24 = vadd.f32 %v1070_v16, %v861_v13  ;;  %v3676_v7 = vld [vmem:[#allocation3 + $0x148] sm:$0xff]  ;;  %v752_v13 = vld [vmem:[%s3457_s6 + $0x50] sm:$0xff] }
  0xdc   : > { %v800_v16 = vld [vmem:[%s3457_s6 + $0x1d0] sm:$0xff]  ;;  %1268 = vmatpush.msrb.mxu2 %v752_v13 }
  0xdd   : > { %v957_v25 = vpop.f32.mrf.mxu2  ;;  %2677 = vst [vmem:[%s3638_s19 + $0x30] sm:$0xff] %v1071_v24  ;;  %908 = vmatmul.f32.gmra.mxu0 %v3654_v12  ;;  %1117 = vmatmul.f32.gmra.mxu1 %v3656_v17 }
  0xde   : > { %v1166_v29 = vpop.f32.mrf.mxu3  ;;  %1477 = vmatpush.msrb.mxu3 %v800_v16  ;;  %v3696_v16 = vld [vmem:[#allocation3 + $0x168] sm:$0xff] }
  0xdf   : > { %v1167_v30 = vadd.f32 %v1166_v29, %v957_v25  ;;  %v720_v29 = vld [vmem:[#allocation3 + $0x350] sm:$0xff] }
  0xe1   : > { %2773 = vst [vmem:[%s3638_s19 + $0x330] sm:$0xff] %v1167_v30  ;;  %v721_v30 = vld [vmem:[#allocation3 + $0x358] sm:$0xff] }
  0xe2   : > { %1007 = vmatmul.f32.gmra.mxu2 %v716_v32  ;;  %v864_v42 = vpop.f32.mrf.mxu0  ;;  %v1073_v43 = vpop.f32.mrf.mxu1  ;;  %v753_v32 = vld [vmem:[%s3457_s6 + $0x58] sm:$0xff] }
  0xe3   : > { %1216 = vmatmul.f32.gmra.mxu3 %v717_v33  ;;  %v1074_v46 = vadd.f32 %v1073_v43, %v864_v42  ;;  %v801_v33 = vld [vmem:[%s3457_s6 + $0x1d8] sm:$0xff]  ;;  %1686 = vmatpush.msrb.mxu0 %v753_v32  ;;  %v3686_v42 = vld [vmem:[#allocation3 + $0x150] sm:$0xff] }
  0xe4   : > { %1895 = vmatpush.msrb.mxu1 %v801_v33  ;;  %v3688_v43 = vld [vmem:[#allocation3 + $0x158] sm:$0xff]  ;;  %v724_v32 = vld [vmem:[#allocation3 + $0x370] sm:$0xff] }
  0xe5   : > { %v960_v47 = vpop.f32.mrf.mxu2  ;;  %2680 = vst [vmem:[%s3638_s19 + $0x48] sm:$0xff] %v1074_v46  ;;  %911 = vmatmul.f32.gmra.mxu0 %v3666_v44  ;;  %1120 = vmatmul.f32.gmra.mxu1 %v3668_v45  ;;  %v725_v33 = vld [vmem:[#allocation3 + $0x378] sm:$0xff] }
  0xe6   : > { %v1169_v52 = vpop.f32.mrf.mxu3 }
  0xe7   : > { %v1170_v53 = vadd.f32 %v1169_v52, %v960_v47 }
  0xe9   : > { %2776 = vst [vmem:[%s3638_s19 + $0x348] sm:$0xff] %v1170_v53 }
  0xea   : > { %1010 = vmatmul.f32.gmra.mxu2 %v718_v60  ;;  %v867_v1 = vpop.f32.mrf.mxu0  ;;  %v1076_v6 = vpop.f32.mrf.mxu1  ;;  %v722_v60 = vld [vmem:[#allocation3 + $0x360] sm:$0xff] }
  0xeb   : > { %1219 = vmatmul.f32.gmra.mxu3 %v719_v61  ;;  %v1077_v18 = vadd.f32 %v1076_v6, %v867_v1  ;;  %v723_v61 = vld [vmem:[#allocation3 + $0x368] sm:$0xff]  ;;  %v3694_v1 = vld [vmem:[#allocation3 + $0x160] sm:$0xff] }
  0xed   : > { %v963_v19 = vpop.f32.mrf.mxu2  ;;  %2683 = vst [vmem:[%s3638_s19 + $0x60] sm:$0xff] %v1077_v18  ;;  %914 = vmatmul.f32.gmra.mxu0 %v3674_v0  ;;  %1123 = vmatmul.f32.gmra.mxu1 %v3676_v7  ;;  %v749_v18 = vld [vmem:[%s3457_s6 + $0x38] sm:$0xff] }
  0xee   : > { %v1172_v24 = vpop.f32.mrf.mxu3  ;;  %1269 = vmatpush.msrb.mxu2 %v749_v18  ;;  %v726_v18 = vld [vmem:[#allocation3 + $0x380] sm:$0xff] }
  0xef   : > { %v1173_v25 = vadd.f32 %v1172_v24, %v963_v19  ;;  %v797_v19 = vld [vmem:[%s3457_s6 + $0x1b8] sm:$0xff] }
  0xf0   : > { %1478 = vmatpush.msrb.mxu3 %v797_v19  ;;  %v727_v19 = vld [vmem:[#allocation3 + $0x388] sm:$0xff] }
  0xf1   : > { %2779 = vst [vmem:[%s3638_s19 + $0x360] sm:$0xff] %v1173_v25 }
  0xf2   : > { %1013 = vmatmul.f32.gmra.mxu2 %v720_v29  ;;  %v870_v38 = vpop.f32.mrf.mxu0  ;;  %v1079_v39 = vpop.f32.mrf.mxu1 }
  0xf3   : > { %1222 = vmatmul.f32.gmra.mxu3 %v721_v30  ;;  %v1080_v46 = vadd.f32 %v1079_v39, %v870_v38  ;;  %v750_v38 = vld [vmem:[%s3457_s6 + $0x40] sm:$0xff] }
  0xf4   : > { %v798_v39 = vld [vmem:[%s3457_s6 + $0x1c0] sm:$0xff]  ;;  %1687 = vmatpush.msrb.mxu0 %v750_v38 }
  0xf5   : > { %v966_v47 = vpop.f32.mrf.mxu2  ;;  %2686 = vst [vmem:[%s3638_s19 + $0x78] sm:$0xff] %v1080_v46  ;;  %917 = vmatmul.f32.gmra.mxu0 %v3686_v42  ;;  %1126 = vmatmul.f32.gmra.mxu1 %v3688_v43 }
  0xf6   : > { %v1175_v52 = vpop.f32.mrf.mxu3  ;;  %1896 = vmatpush.msrb.mxu1 %v798_v39 }
  0xf7   : > { %v1176_v53 = vadd.f32 %v1175_v52, %v966_v47  ;;  %v3706_v52 = vld [vmem:[#allocation3 + $0x170] sm:$0xff] }
  0xf9   : > { %2782 = vst [vmem:[%s3638_s19 + $0x378] sm:$0xff] %v1176_v53  ;;  %v3708_v53 = vld [vmem:[#allocation3 + $0x178] sm:$0xff] }
  0xfa   : > { %1016 = vmatmul.f32.gmra.mxu2 %v722_v60  ;;  %v873_v6 = vpop.f32.mrf.mxu0  ;;  %v1082_v13 = vpop.f32.mrf.mxu1 }
  0xfb   : > { %1225 = vmatmul.f32.gmra.mxu3 %v723_v61  ;;  %v1083_v24 = vadd.f32 %v1082_v13, %v873_v6 }
  0xfd   : > { %v969_v25 = vpop.f32.mrf.mxu2  ;;  %2689 = vst [vmem:[%s3638_s19 + $0x90] sm:$0xff] %v1083_v24  ;;  %920 = vmatmul.f32.gmra.mxu0 %v3694_v1  ;;  %1129 = vmatmul.f32.gmra.mxu1 %v3696_v16  ;;  %v3714_v24 = vld [vmem:[#allocation3 + $0x180] sm:$0xff] }
  0xfe   : > { %v1178_v29 = vpop.f32.mrf.mxu3 }
  0xff   : > { %v1179_v30 = vadd.f32 %v1178_v29, %v969_v25 }
 0x101   : > { %2785 = vst [vmem:[%s3638_s19 + $0x390] sm:$0xff] %v1179_v30  ;;  %v3716_v30 = vld [vmem:[#allocation3 + $0x188] sm:$0xff] }
 0x102   : > { %1019 = vmatmul.f32.gmra.mxu2 %v724_v32  ;;  %v876_v46 = vpop.f32.mrf.mxu0  ;;  %v1085_v47 = vpop.f32.mrf.mxu1  ;;  %v746_v32 = vld [vmem:[%s3457_s6 + $0x20] sm:$0xff] }
 0x103   : > { %1228 = vmatmul.f32.gmra.mxu3 %v725_v33  ;;  %v1086_v60 = vadd.f32 %v1085_v47, %v876_v46  ;;  %v794_v33 = vld [vmem:[%s3457_s6 + $0x1a0] sm:$0xff]  ;;  %1270 = vmatpush.msrb.mxu2 %v746_v32 }
 0x104   : > { %1479 = vmatpush.msrb.mxu3 %v794_v33 }
 0x105   : > { %v972_v61 = vpop.f32.mrf.mxu2  ;;  %2692 = vst [vmem:[%s3638_s19 + $0xa8] sm:$0xff] %v1086_v60  ;;  %923 = vmatmul.f32.gmra.mxu0 %v3706_v52  ;;  %1132 = vmatmul.f32.gmra.mxu1 %v3708_v53  ;;  %v728_v60 = vld [vmem:[#allocation3 + $0x390] sm:$0xff] }
 0x106   : > { %v1181_v6 = vpop.f32.mrf.mxu3 }
 0x107   : > { %v1182_v13 = vadd.f32 %v1181_v6, %v972_v61  ;;  %v729_v61 = vld [vmem:[#allocation3 + $0x398] sm:$0xff]  ;;  %v747_v6 = vld [vmem:[%s3457_s6 + $0x28] sm:$0xff] }
 0x108   : > { %1688 = vmatpush.msrb.mxu0 %v747_v6 }
 0x109   : > { %2788 = vst [vmem:[%s3638_s19 + $0x3a8] sm:$0xff] %v1182_v13  ;;  %v795_v13 = vld [vmem:[%s3457_s6 + $0x1a8] sm:$0xff] }
 0x10a   : > { %1022 = vmatmul.f32.gmra.mxu2 %v726_v18  ;;  %v879_v25 = vpop.f32.mrf.mxu0  ;;  %v1088_v29 = vpop.f32.mrf.mxu1  ;;  %1897 = vmatpush.msrb.mxu1 %v795_v13  ;;  %v3736_v13 = vld [vmem:[#allocation3 + $0x1a8] sm:$0xff] }
 0x10b   : > { %1231 = vmatmul.f32.gmra.mxu3 %v727_v19  ;;  %v1089_v38 = vadd.f32 %v1088_v29, %v879_v25  ;;  %v3726_v25 = vld [vmem:[#allocation3 + $0x190] sm:$0xff]  ;;  %v3728_v29 = vld [vmem:[#allocation3 + $0x198] sm:$0xff]  ;;  %4144 = vst [vmem:[#allocation14_spill] sm:$0xff] %v3736_v13 }
 0x10c   : > { %4142 = vst [vmem:[#allocation12_spill] sm:$0xff] %v3726_v25 }
 0x10d   : > { %v975_v39 = vpop.f32.mrf.mxu2  ;;  %2695 = vst [vmem:[%s3638_s19 + $0xc0] sm:$0xff] %v1089_v38  ;;  %926 = vmatmul.f32.gmra.mxu0 %v3714_v24  ;;  %1135 = vmatmul.f32.gmra.mxu1 %v3716_v30 }
 0x10e   : > { %v1184_v46 = vpop.f32.mrf.mxu3  ;;  %4143 = vst [vmem:[#allocation13_spill] sm:$0xff] %v3728_v29 }
 0x10f   : > { %v1185_v47 = vadd.f32 %v1184_v46, %v975_v39  ;;  %v730_v46 = vld [vmem:[#allocation3 + $0x3a0] sm:$0xff] }
 0x111   : > { %2791 = vst [vmem:[%s3638_s19 + $0x3c0] sm:$0xff] %v1185_v47  ;;  %v731_v47 = vld [vmem:[#allocation3 + $0x3a8] sm:$0xff] }
 0x112   : > { %1025 = vmatmul.f32.gmra.mxu2 %v728_v60  ;;  %v882_v18 = vpop.f32.mrf.mxu0  ;;  %v1091_v19 = vpop.f32.mrf.mxu1  ;;  %v3734_v60 = vld [vmem:[#allocation3 + $0x1a0] sm:$0xff] }
 0x113   : > { %1234 = vmatmul.f32.gmra.mxu3 %v729_v61  ;;  %v1092_v32 = vadd.f32 %v1091_v19, %v882_v18  ;;  %v743_v18 = vld [vmem:[%s3457_s6 + $0x8] sm:$0xff] }
 0x114   : > { %v791_v19 = vld [vmem:[%s3457_s6 + $0x188] sm:$0xff]  ;;  %1271 = vmatpush.msrb.mxu2 %v743_v18  ;;  %v3746_v18 = vld [vmem:[#allocation3 + $0x1b0] sm:$0xff] }
 0x115   : > { %v978_v33 = vpop.f32.mrf.mxu2  ;;  %2698 = vst [vmem:[%s3638_s19 + $0xd8] sm:$0xff] %v1092_v32  ;;  %929 = vmatmul.f32.gmra.mxu0 %v3726_v25  ;;  %1138 = vmatmul.f32.gmra.mxu1 %v3728_v29  ;;  %v744_v29 = vld [vmem:[%s3457_s6 + $0x10] sm:$0xff] }
 0x116   : > { %v1187_v38 = vpop.f32.mrf.mxu3  ;;  %1480 = vmatpush.msrb.mxu3 %v791_v19  ;;  %v792_v25 = vld [vmem:[%s3457_s6 + $0x190] sm:$0xff]  ;;  %1689 = vmatpush.msrb.mxu0 %v744_v29  ;;  %4145 = vst [vmem:[#allocation15_spill] sm:$0xff] %v3746_v18  ;;  %v3748_v19 = vld [vmem:[#allocation3 + $0x1b8] sm:$0xff] }
 0x117   : > { %v1188_v39 = vadd.f32 %v1187_v38, %v978_v33  ;;  %1898 = vmatpush.msrb.mxu1 %v792_v25  ;;  %4146 = vst [vmem:[#allocation16_spill] sm:$0xff] %v3748_v19  ;;  %v734_v25 = vld [vmem:[#allocation3 + $0x3c0] sm:$0xff] }
 0x119   : > { %2794 = vst [vmem:[%s3638_s19 + $0x3d8] sm:$0xff] %v1188_v39 }
 0x11a   : > { %1028 = vmatmul.f32.gmra.mxu2 %v730_v46  ;;  %v885_v61 = vpop.f32.mrf.mxu0  ;;  %v1094_v6 = vpop.f32.mrf.mxu1  ;;  %v732_v46 = vld [vmem:[#allocation3 + $0x3b0] sm:$0xff] }
 0x11b   : > { %1237 = vmatmul.f32.gmra.mxu3 %v731_v47  ;;  %v1095_v32 = vadd.f32 %v1094_v6, %v885_v61  ;;  %v733_v47 = vld [vmem:[#allocation3 + $0x3b8] sm:$0xff] }
 0x11d   : > { %v981_v33 = vpop.f32.mrf.mxu2  ;;  %2701 = vst [vmem:[%s3638_s19 + $0xf0] sm:$0xff] %v1095_v32  ;;  %932 = vmatmul.f32.gmra.mxu0 %v3734_v60  ;;  %1141 = vmatmul.f32.gmra.mxu1 %v3736_v13 }
 0x11e   : > { %v1190_v38 = vpop.f32.mrf.mxu3 }
 0x11f   : > { %v1191_v39 = vadd.f32 %v1190_v38, %v981_v33  ;;  %v735_v38 = vld [vmem:[#allocation3 + $0x3c8] sm:$0xff] }
 0x121   : > { %2797 = vst [vmem:[%s3638_s19 + $0x3f0] sm:$0xff] %v1191_v39 }
 0x122   : > { %1031 = vmatmul.f32.gmra.mxu2 %v732_v46  ;;  %v888_v61 = vpop.f32.mrf.mxu0  ;;  %v1097_v6 = vpop.f32.mrf.mxu1 }
 0x123   : > { %1240 = vmatmul.f32.gmra.mxu3 %v733_v47  ;;  %v1098_v32 = vadd.f32 %v1097_v6, %v888_v61  ;;  %v3754_v47 = vld [vmem:[#allocation3 + $0x1c0] sm:$0xff]  ;;  %v3756_v61 = vld [vmem:[#allocation3 + $0x1c8] sm:$0xff] }
 0x124   : > { %4147 = vst [vmem:[#allocation17_spill] sm:$0xff] %v3754_v47 }
 0x125   : > { %v984_v13 = vpop.f32.mrf.mxu2  ;;  %2704 = vst [vmem:[%s3638_s19 + $0x108] sm:$0xff] %v1098_v32  ;;  %935 = vmatmul.f32.gmra.mxu0 %v3746_v18  ;;  %1144 = vmatmul.f32.gmra.mxu1 %v3748_v19  ;;  %v3762_v19 = vld [vmem:[#allocation3 + $0x1d0] sm:$0xff] }
 0x126   : > { %v1193_v33 = vpop.f32.mrf.mxu3  ;;  %4148 = vst [vmem:[#allocation18_spill] sm:$0xff] %v3756_v61 }
 0x127   : > { %v1194_v29 = vadd.f32 %v1193_v33, %v984_v13  ;;  %v736_v33 = vld [vmem:[#allocation3 + $0x3d0] sm:$0xff]  ;;  %4149 = vst [vmem:[#allocation19_spill] sm:$0xff] %v3762_v19 }
 0x129   : > { %2800 = vst [vmem:[%s3638_s19 + $0x408] sm:$0xff] %v1194_v29  ;;  %v737_v29 = vld [vmem:[#allocation3 + $0x3d8] sm:$0xff] }
 0x12a   : > { %1034 = vmatmul.f32.gmra.mxu2 %v734_v25  ;;  %v891_v39 = vpop.f32.mrf.mxu0  ;;  %v1100_v46 = vpop.f32.mrf.mxu1 }
 0x12b   : > { %1243 = vmatmul.f32.gmra.mxu3 %v735_v38  ;;  %v1101_v6 = vadd.f32 %v1100_v46, %v891_v39  ;;  %v3764_v39 = vld [vmem:[#allocation3 + $0x1d8] sm:$0xff] }
 0x12c   : > { %4150 = vst [vmem:[#allocation20_spill] sm:$0xff] %v3764_v39 }
 0x12d   : > { %v987_v32 = vpop.f32.mrf.mxu2  ;;  %2707 = vst [vmem:[%s3638_s19 + $0x120] sm:$0xff] %v1101_v6  ;;  %938 = vmatmul.f32.gmra.mxu0 %v3754_v47  ;;  %1147 = vmatmul.f32.gmra.mxu1 %v3756_v61  ;;  %v3770_v61 = vld [vmem:[#allocation3 + $0x1e0] sm:$0xff] }
 0x12e   : > { %v1196_v18 = vpop.f32.mrf.mxu3  ;;  %4151 = vst [vmem:[#allocation21_spill] sm:$0xff] %v3770_v61 }
 0x12f   : > { %v1197_v13 = vadd.f32 %v1196_v18, %v987_v32  ;;  %v738_v32 = vld [vmem:[#allocation3 + $0x3e0] sm:$0xff] }
 0x131   : > { %2803 = vst [vmem:[%s3638_s19 + $0x420] sm:$0xff] %v1197_v13  ;;  %v739_v13 = vld [vmem:[#allocation3 + $0x3e8] sm:$0xff] }
 0x132   : > { %1037 = vmatmul.f32.gmra.mxu2 %v736_v33  ;;  %v894_v25 = vpop.f32.mrf.mxu0  ;;  %v1103_v38 = vpop.f32.mrf.mxu1 }
 0x133   : > { %1246 = vmatmul.f32.gmra.mxu3 %v737_v29  ;;  %v1104_v46 = vadd.f32 %v1103_v38, %v894_v25  ;;  %v3772_v25 = vld [vmem:[#allocation3 + $0x1e8] sm:$0xff] }
 0x135   : > { %v990_v6 = vpop.f32.mrf.mxu2  ;;  %2710 = vst [vmem:[%s3638_s19 + $0x138] sm:$0xff] %v1104_v46  ;;  %941 = vmatmul.f32.gmra.mxu0 %v3762_v19  ;;  %1150 = vmatmul.f32.gmra.mxu1 %v3764_v39  ;;  %v3778_v39 = vld [vmem:[#allocation3 + $0x1f0] sm:$0xff] }
 0x136   : > { %v1199_v47 = vpop.f32.mrf.mxu3 }
 0x137   : > { %v1200_v18 = vadd.f32 %v1199_v47, %v990_v6  ;;  %v740_v6 = vld [vmem:[#allocation3 + $0x3f0] sm:$0xff] }
 0x139   : > { %2806 = vst [vmem:[%s3638_s19 + $0x438] sm:$0xff] %v1200_v18  ;;  %v741_v18 = vld [vmem:[#allocation3 + $0x3f8] sm:$0xff] }
 0x13a   : > { %1040 = vmatmul.f32.gmra.mxu2 %v738_v32  ;;  %v897_v33 = vpop.f32.mrf.mxu0  ;;  %v1106_v29 = vpop.f32.mrf.mxu1 }
 0x13b   : > { %1249 = vmatmul.f32.gmra.mxu3 %v739_v13  ;;  %v1107_v38 = vadd.f32 %v1106_v29, %v897_v33  ;;  %v3780_v33 = vld [vmem:[#allocation3 + $0x1f8] sm:$0xff] }
 0x13c   : > { %4152 = vst [vmem:[#allocation22_spill] sm:$0xff] %v3780_v33 }
 0x13d   : > { %v993_v46 = vpop.f32.mrf.mxu2  ;;  %2713 = vst [vmem:[%s3638_s19 + $0x150] sm:$0xff] %v1107_v38  ;;  %944 = vmatmul.f32.gmra.mxu0 %v3770_v61  ;;  %1153 = vmatmul.f32.gmra.mxu1 %v3772_v25 }
 0x13e   : > { %v1202_v19 = vpop.f32.mrf.mxu3 }
 0x13f   : > { %v1203_v47 = vadd.f32 %v1202_v19, %v993_v46 }
 0x141   : > { %2809 = vst [vmem:[%s3638_s19 + $0x450] sm:$0xff] %v1203_v47 }
 0x142   : > { %1043 = vmatmul.f32.gmra.mxu2 %v740_v6  ;;  %v900_v32 = vpop.f32.mrf.mxu0  ;;  %v1109_v13 = vpop.f32.mrf.mxu1 }
 0x143   : > { %1252 = vmatmul.f32.gmra.mxu3 %v741_v18  ;;  %v1110_v29 = vadd.f32 %v1109_v13, %v900_v32  ;;  %v3118_v13 = vld [vmem:[#allocation3] sm:$0xff] }
 0x145   : > { %v996_v38 = vpop.f32.mrf.mxu2  ;;  %2716 = vst [vmem:[%s3638_s19 + $0x168] sm:$0xff] %v1110_v29  ;;  %947 = vmatmul.f32.gmra.mxu0 %v3778_v39  ;;  %1156 = vmatmul.f32.gmra.mxu1 %v3780_v33  ;;  %v3119_v29 = vld [vmem:[#allocation3 + $0x8] sm:$0xff] }
 0x146   : > { %v1205_v61 = vpop.f32.mrf.mxu3 }
 0x147   : > { %v1206_v19 = vadd.f32 %v1205_v61, %v996_v38 }
 0x149   : > { %2812 = vst [vmem:[%s3638_s19 + $0x468] sm:$0xff] %v1206_v19 }
 0x14a   : > { %1272 = vmatmul.f32.vlgmr.msrb.gmra.mxu2 %v3497_v36  ;;  %v903_v46 = vpop.f32.mrf.mxu0  ;;  %v1112_v47 = vpop.f32.mrf.mxu1 }
 0x14b   : > { %1481 = vmatmul.f32.vlgmr.msrb.gmra.mxu3 %v3499_v37  ;;  %v1113_v6 = vadd.f32 %v1112_v47, %v903_v46 }
 0x14d   : > { %v999_v18 = vpop.f32.mrf.mxu2  ;;  %2719 = vst [vmem:[%s3638_s19 + $0x180] sm:$0xff] %v1113_v6  ;;  %1690 = vmatmul.f32.vlgmr.msrb.gmra.mxu0 %v3118_v13  ;;  %1899 = vmatmul.f32.vlgmr.msrb.gmra.mxu1 %v3119_v29 }
 0x14e   : > { %v1208_v32 = vpop.f32.mrf.mxu3 }
 0x14f   : > { %v1209_v33 = vadd.f32 %v1208_v32, %v999_v18 }
 0x151   : > { %2815 = vst [vmem:[%s3638_s19 + $0x480] sm:$0xff] %v1209_v33 }
 0x152   : > { %1275 = vmatmul.f32.gmra.mxu2 %v3513_v50  ;;  %v906_v36 = vpop.f32.mrf.mxu0  ;;  %v1115_v37 = vpop.f32.mrf.mxu1 }
 0x153   : > { %1484 = vmatmul.f32.gmra.mxu3 %v3515_v51  ;;  %v1116_v61 = vadd.f32 %v1115_v37, %v906_v36 }
 0x155   : > { %v1002_v38 = vpop.f32.mrf.mxu2  ;;  %2722 = vst [vmem:[%s3638_s19 + $0x198] sm:$0xff] %v1116_v61  ;;  %1693 = vmatmul.f32.gmra.mxu0 %v3513_v50  ;;  %1902 = vmatmul.f32.gmra.mxu1 %v3515_v51 }
 0x156   : > { %v1211_v19 = vpop.f32.mrf.mxu3 }
 0x157   : > { %v1212_v46 = vadd.f32 %v1211_v19, %v1002_v38 }
 0x159   : > { %2818 = vst [vmem:[%s3638_s19 + $0x498] sm:$0xff] %v1212_v46 }
 0x15a   : > { %1278 = vmatmul.f32.gmra.mxu2 %v3519_v54  ;;  %v909_v33 = vpop.f32.mrf.mxu0  ;;  %v1118_v47 = vpop.f32.mrf.mxu1 }
 0x15b   : > { %1487 = vmatmul.f32.gmra.mxu3 %v3521_v55  ;;  %v1119_v6 = vadd.f32 %v1118_v47, %v909_v33 }
 0x15d   : > { %v1005_v18 = vpop.f32.mrf.mxu2  ;;  %2725 = vst [vmem:[%s3638_s19 + $0x1b0] sm:$0xff] %v1119_v6  ;;  %1696 = vmatmul.f32.gmra.mxu0 %v3519_v54  ;;  %1905 = vmatmul.f32.gmra.mxu1 %v3521_v55 }
 0x15e   : > { %v1214_v32 = vpop.f32.mrf.mxu3 }
 0x15f   : > { %v1215_v50 = vadd.f32 %v1214_v32, %v1005_v18 }
 0x161   : > { %2821 = vst [vmem:[%s3638_s19 + $0x4b0] sm:$0xff] %v1215_v50 }
 0x162   : > { %1281 = vmatmul.f32.gmra.mxu2 %v3529_v62  ;;  %v912_v51 = vpop.f32.mrf.mxu0  ;;  %v1121_v13 = vpop.f32.mrf.mxu1 }
 0x163   : > { %1490 = vmatmul.f32.gmra.mxu3 %v3531_v63  ;;  %v1122_v29 = vadd.f32 %v1121_v13, %v912_v51 }
 0x165   : > { %v1008_v36 = vpop.f32.mrf.mxu2  ;;  %2728 = vst [vmem:[%s3638_s19 + $0x1c8] sm:$0xff] %v1122_v29  ;;  %1699 = vmatmul.f32.gmra.mxu0 %v3529_v62  ;;  %1908 = vmatmul.f32.gmra.mxu1 %v3531_v63 }
 0x166   : > { %v1217_v37 = vpop.f32.mrf.mxu3 }
 0x167   : > { %v1218_v54 = vadd.f32 %v1217_v37, %v1008_v36 }
 0x169   : > { %2824 = vst [vmem:[%s3638_s19 + $0x4c8] sm:$0xff] %v1218_v54 }
 0x16a   : > { %1284 = vmatmul.f32.gmra.mxu2 %v3535_v2  ;;  %v915_v55 = vpop.f32.mrf.mxu0  ;;  %v1124_v61 = vpop.f32.mrf.mxu1 }
 0x16b   : > { %1493 = vmatmul.f32.gmra.mxu3 %v3537_v3  ;;  %v1125_v38 = vadd.f32 %v1124_v61, %v915_v55 }
 0x16d   : > { %v1011_v19 = vpop.f32.mrf.mxu2  ;;  %2731 = vst [vmem:[%s3638_s19 + $0x1e0] sm:$0xff] %v1125_v38  ;;  %1702 = vmatmul.f32.gmra.mxu0 %v3535_v2  ;;  %1911 = vmatmul.f32.gmra.mxu1 %v3537_v3 }
 0x16e   : > { %v1220_v46 = vpop.f32.mrf.mxu3 }
 0x16f   : > { %v1221_v62 = vadd.f32 %v1220_v46, %v1011_v19 }
 0x171   : > { %2827 = vst [vmem:[%s3638_s19 + $0x4e0] sm:$0xff] %v1221_v62 }
 0x172   : > { %1287 = vmatmul.f32.gmra.mxu2 %v3545_v10  ;;  %v918_v63 = vpop.f32.mrf.mxu0  ;;  %v1127_v33 = vpop.f32.mrf.mxu1 }
 0x173   : > { %1496 = vmatmul.f32.gmra.mxu3 %v3547_v11  ;;  %v1128_v47 = vadd.f32 %v1127_v33, %v918_v63 }
 0x175   : > { %v1014_v6 = vpop.f32.mrf.mxu2  ;;  %2734 = vst [vmem:[%s3638_s19 + $0x1f8] sm:$0xff] %v1128_v47  ;;  %1705 = vmatmul.f32.gmra.mxu0 %v3545_v10  ;;  %1914 = vmatmul.f32.gmra.mxu1 %v3547_v11 }
 0x176   : > { %v1223_v18 = vpop.f32.mrf.mxu3 }
 0x177   : > { %v1224_v2 = vadd.f32 %v1223_v18, %v1014_v6 }
 0x179   : > { %2830 = vst [vmem:[%s3638_s19 + $0x4f8] sm:$0xff] %v1224_v2 }
 0x17a   : > { %1290 = vmatmul.f32.gmra.mxu2 %v3551_v14  ;;  %v921_v3 = vpop.f32.mrf.mxu0  ;;  %v1130_v32 = vpop.f32.mrf.mxu1 }
 0x17b   : > { %1499 = vmatmul.f32.gmra.mxu3 %v3553_v15  ;;  %v1131_v50 = vadd.f32 %v1130_v32, %v921_v3 }
 0x17d   : > { %v1017_v51 = vpop.f32.mrf.mxu2  ;;  %2737 = vst [vmem:[%s3638_s19 + $0x210] sm:$0xff] %v1131_v50  ;;  %1708 = vmatmul.f32.gmra.mxu0 %v3551_v14  ;;  %1917 = vmatmul.f32.gmra.mxu1 %v3553_v15 }
 0x17e   : > { %v1226_v13 = vpop.f32.mrf.mxu3 }
 0x17f   : > { %v1227_v10 = vadd.f32 %v1226_v13, %v1017_v51 }
 0x181   : > { %2833 = vst [vmem:[%s3638_s19 + $0x510] sm:$0xff] %v1227_v10 }
 0x182   : > { %1293 = vmatmul.f32.gmra.mxu2 %v3561_v22  ;;  %v924_v11 = vpop.f32.mrf.mxu0  ;;  %v1133_v29 = vpop.f32.mrf.mxu1 }
 0x183   : > { %1502 = vmatmul.f32.gmra.mxu3 %v3563_v23  ;;  %v1134_v36 = vadd.f32 %v1133_v29, %v924_v11 }
 0x185   : > { %v1020_v37 = vpop.f32.mrf.mxu2  ;;  %2740 = vst [vmem:[%s3638_s19 + $0x228] sm:$0xff] %v1134_v36  ;;  %1711 = vmatmul.f32.gmra.mxu0 %v3561_v22  ;;  %1920 = vmatmul.f32.gmra.mxu1 %v3563_v23 }
 0x186   : > { %v1229_v54 = vpop.f32.mrf.mxu3 }
 0x187   : > { %v1230_v14 = vadd.f32 %v1229_v54, %v1020_v37 }
 0x189   : > { %2836 = vst [vmem:[%s3638_s19 + $0x528] sm:$0xff] %v1230_v14 }
 0x18a   : > { %1296 = vmatmul.f32.gmra.mxu2 %v3567_v26  ;;  %v927_v15 = vpop.f32.mrf.mxu0  ;;  %v1136_v55 = vpop.f32.mrf.mxu1 }
 0x18b   : > { %1505 = vmatmul.f32.gmra.mxu3 %v3569_v27  ;;  %v1137_v61 = vadd.f32 %v1136_v55, %v927_v15 }
 0x18d   : > { %v1023_v38 = vpop.f32.mrf.mxu2  ;;  %2743 = vst [vmem:[%s3638_s19 + $0x240] sm:$0xff] %v1137_v61  ;;  %1714 = vmatmul.f32.gmra.mxu0 %v3567_v26  ;;  %1923 = vmatmul.f32.gmra.mxu1 %v3569_v27 }
 0x18e   : > { %v1232_v19 = vpop.f32.mrf.mxu3 }
 0x18f   : > { %v1233_v22 = vadd.f32 %v1232_v19, %v1023_v38 }
 0x191   : > { %2839 = vst [vmem:[%s3638_s19 + $0x540] sm:$0xff] %v1233_v22 }
 0x192   : > { %1299 = vmatmul.f32.gmra.mxu2 %v3577_v34  ;;  %v930_v23 = vpop.f32.mrf.mxu0  ;;  %v1139_v46 = vpop.f32.mrf.mxu1 }
 0x193   : > { %1508 = vmatmul.f32.gmra.mxu3 %v3579_v35  ;;  %v1140_v62 = vadd.f32 %v1139_v46, %v930_v23 }
 0x195   : > { %v1026_v63 = vpop.f32.mrf.mxu2  ;;  %2746 = vst [vmem:[%s3638_s19 + $0x258] sm:$0xff] %v1140_v62  ;;  %1717 = vmatmul.f32.gmra.mxu0 %v3577_v34  ;;  %1926 = vmatmul.f32.gmra.mxu1 %v3579_v35 }
 0x196   : > { %v1235_v33 = vpop.f32.mrf.mxu3 }
 0x197   : > { %v1236_v26 = vadd.f32 %v1235_v33, %v1026_v63 }
 0x199   : > { %2842 = vst [vmem:[%s3638_s19 + $0x558] sm:$0xff] %v1236_v26 }
 0x19a   : > { %1302 = vmatmul.f32.gmra.mxu2 %v3583_v40  ;;  %v933_v27 = vpop.f32.mrf.mxu0  ;;  %v1142_v47 = vpop.f32.mrf.mxu1 }
 0x19b   : > { %1511 = vmatmul.f32.gmra.mxu3 %v3585_v41  ;;  %v1143_v6 = vadd.f32 %v1142_v47, %v933_v27 }
 0x19d   : > { %v1029_v18 = vpop.f32.mrf.mxu2  ;;  %2749 = vst [vmem:[%s3638_s19 + $0x270] sm:$0xff] %v1143_v6  ;;  %1720 = vmatmul.f32.gmra.mxu0 %v3583_v40  ;;  %1929 = vmatmul.f32.gmra.mxu1 %v3585_v41 }
 0x19e   : > { %v1238_v2 = vpop.f32.mrf.mxu3 }
 0x19f   : > { %v1239_v34 = vadd.f32 %v1238_v2, %v1029_v18 }
 0x1a1   : > { %2845 = vst [vmem:[%s3638_s19 + $0x570] sm:$0xff] %v1239_v34 }
 0x1a2   : > { %1305 = vmatmul.f32.gmra.mxu2 %v3593_v48  ;;  %v936_v35 = vpop.f32.mrf.mxu0  ;;  %v1145_v3 = vpop.f32.mrf.mxu1 }
 0x1a3   : > { %1514 = vmatmul.f32.gmra.mxu3 %v3595_v49  ;;  %v1146_v32 = vadd.f32 %v1145_v3, %v936_v35 }
 0x1a5   : > { %v1032_v50 = vpop.f32.mrf.mxu2  ;;  %2752 = vst [vmem:[%s3638_s19 + $0x288] sm:$0xff] %v1146_v32  ;;  %1723 = vmatmul.f32.gmra.mxu0 %v3593_v48  ;;  %1932 = vmatmul.f32.gmra.mxu1 %v3595_v49 }
 0x1a6   : > { %v1241_v51 = vpop.f32.mrf.mxu3 }
 0x1a7   : > { %v1242_v40 = vadd.f32 %v1241_v51, %v1032_v50 }
 0x1a9   : > { %2848 = vst [vmem:[%s3638_s19 + $0x588] sm:$0xff] %v1242_v40 }
 0x1aa   : > { %1308 = vmatmul.f32.gmra.mxu2 %v3599_v56  ;;  %v939_v41 = vpop.f32.mrf.mxu0  ;;  %v1148_v13 = vpop.f32.mrf.mxu1 }
 0x1ab   : > { %1517 = vmatmul.f32.gmra.mxu3 %v3601_v57  ;;  %v1149_v10 = vadd.f32 %v1148_v13, %v939_v41 }
 0x1ad   : > { %v1035_v11 = vpop.f32.mrf.mxu2  ;;  %2755 = vst [vmem:[%s3638_s19 + $0x2a0] sm:$0xff] %v1149_v10  ;;  %1726 = vmatmul.f32.gmra.mxu0 %v3599_v56  ;;  %1935 = vmatmul.f32.gmra.mxu1 %v3601_v57 }
 0x1ae   : > { %v1244_v29 = vpop.f32.mrf.mxu3 }
 0x1af   : > { %v1245_v48 = vadd.f32 %v1244_v29, %v1035_v11 }
 0x1b1   : > { %2851 = vst [vmem:[%s3638_s19 + $0x5a0] sm:$0xff] %v1245_v48 }
 0x1b2   : > { %1311 = vmatmul.f32.gmra.mxu2 %v3609_v4  ;;  %v942_v49 = vpop.f32.mrf.mxu0  ;;  %v1151_v36 = vpop.f32.mrf.mxu1 }
 0x1b3   : > { %1520 = vmatmul.f32.gmra.mxu3 %v3611_v5  ;;  %v1152_v37 = vadd.f32 %v1151_v36, %v942_v49 }
 0x1b5   : > { %v1038_v54 = vpop.f32.mrf.mxu2  ;;  %2758 = vst [vmem:[%s3638_s19 + $0x2b8] sm:$0xff] %v1152_v37  ;;  %1729 = vmatmul.f32.gmra.mxu0 %v3609_v4  ;;  %1938 = vmatmul.f32.gmra.mxu1 %v3611_v5 }
 0x1b6   : > { %v1247_v14 = vpop.f32.mrf.mxu3 }
 0x1b7   : > { %v1248_v56 = vadd.f32 %v1247_v14, %v1038_v54 }
 0x1b9   : > { %2854 = vst [vmem:[%s3638_s19 + $0x5b8] sm:$0xff] %v1248_v56 }
 0x1ba   : > { %1314 = vmatmul.f32.gmra.mxu2 %v3615_v8  ;;  %v945_v57 = vpop.f32.mrf.mxu0  ;;  %v1154_v15 = vpop.f32.mrf.mxu1 }
 0x1bb   : > { %1523 = vmatmul.f32.gmra.mxu3 %v3617_v9  ;;  %v1155_v55 = vadd.f32 %v1154_v15, %v945_v57 }
 0x1bd   : > { %v1041_v61 = vpop.f32.mrf.mxu2  ;;  %2761 = vst [vmem:[%s3638_s19 + $0x2d0] sm:$0xff] %v1155_v55  ;;  %1732 = vmatmul.f32.gmra.mxu0 %v3615_v8  ;;  %1941 = vmatmul.f32.gmra.mxu1 %v3617_v9 }
 0x1be   : > { %v1250_v38 = vpop.f32.mrf.mxu3 }
 0x1bf   : > { %v1251_v4 = vadd.f32 %v1250_v38, %v1041_v61 }
 0x1c1   : > { %2857 = vst [vmem:[%s3638_s19 + $0x5d0] sm:$0xff] %v1251_v4 }
 0x1c2   : > { %1317 = vmatmul.f32.gmra.mxu2 %v3625_v20  ;;  %v948_v5 = vpop.f32.mrf.mxu0  ;;  %v1157_v19 = vpop.f32.mrf.mxu1 }
 0x1c3   : > { %1526 = vmatmul.f32.gmra.mxu3 %v3627_v21  ;;  %v1158_v22 = vadd.f32 %v1157_v19, %v948_v5 }
 0x1c5   : > { %v1044_v23 = vpop.f32.mrf.mxu2  ;;  %2764 = vst [vmem:[%s3638_s19 + $0x2e8] sm:$0xff] %v1158_v22  ;;  %1735 = vmatmul.f32.gmra.mxu0 %v3625_v20  ;;  %1944 = vmatmul.f32.gmra.mxu1 %v3627_v21  ;;  %v4154_v22 = vld [vmem:[#allocation13_spill] sm:$0xff] }
 0x1c6   : > { %v1253_v46 = vpop.f32.mrf.mxu3 }
 0x1c7   : > { %v1254_v8 = vadd.f32 %v1253_v46, %v1044_v23 }
 0x1c9   : > { %2860 = vst [vmem:[%s3638_s19 + $0x5e8] sm:$0xff] %v1254_v8 }
 0x1ca   : > { %1320 = vmatmul.f32.gmra.mxu2 %v3632_v28  ;;  %v1691_v9 = vpop.f32.mrf.mxu0  ;;  %v1900_v62 = vpop.f32.mrf.mxu1 }
 0x1cb   : > { %1529 = vmatmul.f32.gmra.mxu3 %v3634_v31  ;;  %v1901_v63 = vadd.f32 %v1900_v62, %v1691_v9 }
 0x1cd   : > { %v1273_v33 = vpop.f32.mrf.mxu2  ;;  %2673 = vst [vmem:[%s3638_s19 + $0x10] sm:$0xff] %v1901_v63  ;;  %1738 = vmatmul.f32.gmra.mxu0 %v3632_v28  ;;  %1947 = vmatmul.f32.gmra.mxu1 %v3634_v31 }
 0x1ce   : > { %v1482_v26 = vpop.f32.mrf.mxu3 }
 0x1cf   : > { %v1483_v20 = vadd.f32 %v1482_v26, %v1273_v33 }
 0x1d1   : > { %2672 = vst [vmem:[%s3638_s19 + $0x8] sm:$0xff] %v1483_v20 }
 0x1d2   : > { %1323 = vmatmul.f32.gmra.mxu2 %v3646_v58  ;;  %v1694_v21 = vpop.f32.mrf.mxu0  ;;  %v1903_v27 = vpop.f32.mrf.mxu1 }
 0x1d3   : > { %1532 = vmatmul.f32.gmra.mxu3 %v3648_v59  ;;  %v1904_v47 = vadd.f32 %v1903_v27, %v1694_v21 }
 0x1d5   : > { %v1276_v6 = vpop.f32.mrf.mxu2  ;;  %2676 = vst [vmem:[%s3638_s19 + $0x28] sm:$0xff] %v1904_v47  ;;  %1741 = vmatmul.f32.gmra.mxu0 %v3646_v58  ;;  %1950 = vmatmul.f32.gmra.mxu1 %v3648_v59  ;;  %v4156_v47 = vld [vmem:[#allocation15_spill] sm:$0xff] }
 0x1d6   : > { %v1485_v18 = vpop.f32.mrf.mxu3 }
 0x1d7   : > { %v1486_v28 = vadd.f32 %v1485_v18, %v1276_v6  ;;  %v4157_v6 = vld [vmem:[#allocation16_spill] sm:$0xff] }
 0x1d9   : > { %2675 = vst [vmem:[%s3638_s19 + $0x20] sm:$0xff] %v1486_v28 }
 0x1da   : > { %1326 = vmatmul.f32.gmra.mxu2 %v3654_v12  ;;  %v1697_v31 = vpop.f32.mrf.mxu0  ;;  %v1906_v2 = vpop.f32.mrf.mxu1 }
 0x1db   : > { %1535 = vmatmul.f32.gmra.mxu3 %v3656_v17  ;;  %v1907_v34 = vadd.f32 %v1906_v2, %v1697_v31 }
 0x1dd   : > { %v1279_v35 = vpop.f32.mrf.mxu2  ;;  %2679 = vst [vmem:[%s3638_s19 + $0x40] sm:$0xff] %v1907_v34  ;;  %1744 = vmatmul.f32.gmra.mxu0 %v3654_v12  ;;  %1953 = vmatmul.f32.gmra.mxu1 %v3656_v17 }
 0x1de   : > { %v1488_v3 = vpop.f32.mrf.mxu3 }
 0x1df   : > { %v1489_v58 = vadd.f32 %v1488_v3, %v1279_v35  ;;  %v4158_v35 = vld [vmem:[#allocation17_spill] sm:$0xff]  ;;  %v4159_v3 = vld [vmem:[#allocation18_spill] sm:$0xff] }
 0x1e1   : > { %2678 = vst [vmem:[%s3638_s19 + $0x38] sm:$0xff] %v1489_v58 }
 0x1e2   : > { %1329 = vmatmul.f32.gmra.mxu2 %v3666_v44  ;;  %v1700_v59 = vpop.f32.mrf.mxu0  ;;  %v1909_v32 = vpop.f32.mrf.mxu1 }
 0x1e3   : > { %1538 = vmatmul.f32.gmra.mxu3 %v3668_v45  ;;  %v1910_v50 = vadd.f32 %v1909_v32, %v1700_v59 }
 0x1e5   : > { %v1282_v51 = vpop.f32.mrf.mxu2  ;;  %2682 = vst [vmem:[%s3638_s19 + $0x58] sm:$0xff] %v1910_v50  ;;  %1747 = vmatmul.f32.gmra.mxu0 %v3666_v44  ;;  %1956 = vmatmul.f32.gmra.mxu1 %v3668_v45 }
 0x1e6   : > { %v1491_v40 = vpop.f32.mrf.mxu3 }
 0x1e7   : > { %v1492_v12 = vadd.f32 %v1491_v40, %v1282_v51 }
 0x1e9   : > { %2681 = vst [vmem:[%s3638_s19 + $0x50] sm:$0xff] %v1492_v12  ;;  %v4160_v12 = vld [vmem:[#allocation19_spill] sm:$0xff] }
 0x1ea   : > { %1332 = vmatmul.f32.gmra.mxu2 %v3674_v0  ;;  %v1703_v17 = vpop.f32.mrf.mxu0  ;;  %v1912_v41 = vpop.f32.mrf.mxu1 }
 0x1eb   : > { %1541 = vmatmul.f32.gmra.mxu3 %v3676_v7  ;;  %v1913_v13 = vadd.f32 %v1912_v41, %v1703_v17  ;;  %v4161_v17 = vld [vmem:[#allocation20_spill] sm:$0xff] }
 0x1ed   : > { %v1285_v10 = vpop.f32.mrf.mxu2  ;;  %2685 = vst [vmem:[%s3638_s19 + $0x70] sm:$0xff] %v1913_v13  ;;  %1750 = vmatmul.f32.gmra.mxu0 %v3674_v0  ;;  %1959 = vmatmul.f32.gmra.mxu1 %v3676_v7 }
 0x1ee   : > { %v1494_v11 = vpop.f32.mrf.mxu3 }
 0x1ef   : > { %v1495_v44 = vadd.f32 %v1494_v11, %v1285_v10 }
 0x1f1   : > { %2684 = vst [vmem:[%s3638_s19 + $0x68] sm:$0xff] %v1495_v44 }
 0x1f2   : > { %1335 = vmatmul.f32.gmra.mxu2 %v3686_v42  ;;  %v1706_v45 = vpop.f32.mrf.mxu0  ;;  %v1915_v29 = vpop.f32.mrf.mxu1 }
 0x1f3   : > { %1544 = vmatmul.f32.gmra.mxu3 %v3688_v43  ;;  %v1916_v48 = vadd.f32 %v1915_v29, %v1706_v45  ;;  %v4162_v29 = vld [vmem:[#allocation21_spill] sm:$0xff] }
 0x1f5   : > { %v1288_v49 = vpop.f32.mrf.mxu2  ;;  %2688 = vst [vmem:[%s3638_s19 + $0x88] sm:$0xff] %v1916_v48  ;;  %1753 = vmatmul.f32.gmra.mxu0 %v3686_v42  ;;  %1962 = vmatmul.f32.gmra.mxu1 %v3688_v43 }
 0x1f6   : > { %v1497_v36 = vpop.f32.mrf.mxu3 }
 0x1f7   : > { %v1498_v0 = vadd.f32 %v1497_v36, %v1288_v49 }
 0x1f9   : > { %2687 = vst [vmem:[%s3638_s19 + $0x80] sm:$0xff] %v1498_v0 }
 0x1fa   : > { %1338 = vmatmul.f32.gmra.mxu2 %v3694_v1  ;;  %v1709_v7 = vpop.f32.mrf.mxu0  ;;  %v1918_v37 = vpop.f32.mrf.mxu1 }
 0x1fb   : > { %1547 = vmatmul.f32.gmra.mxu3 %v3696_v16  ;;  %v1919_v54 = vadd.f32 %v1918_v37, %v1709_v7 }
 0x1fd   : > { %v1291_v14 = vpop.f32.mrf.mxu2  ;;  %2691 = vst [vmem:[%s3638_s19 + $0xa0] sm:$0xff] %v1919_v54  ;;  %1756 = vmatmul.f32.gmra.mxu0 %v3694_v1  ;;  %1965 = vmatmul.f32.gmra.mxu1 %v3696_v16  ;;  %v4163_v54 = vld [vmem:[#allocation22_spill] sm:$0xff] }
 0x1fe   : > { %v1500_v56 = vpop.f32.mrf.mxu3 }
 0x1ff   : > { %v1501_v42 = vadd.f32 %v1500_v56, %v1291_v14 }
 0x201   : > { %2690 = vst [vmem:[%s3638_s19 + $0x98] sm:$0xff] %v1501_v42 }
 0x202   : > { %1341 = vmatmul.f32.gmra.mxu2 %v3706_v52  ;;  %v1712_v43 = vpop.f32.mrf.mxu0  ;;  %v1921_v57 = vpop.f32.mrf.mxu1 }
 0x203   : > { %1550 = vmatmul.f32.gmra.mxu3 %v3708_v53  ;;  %v1922_v15 = vadd.f32 %v1921_v57, %v1712_v43 }
 0x205   : > { %v1294_v55 = vpop.f32.mrf.mxu2  ;;  %2694 = vst [vmem:[%s3638_s19 + $0xb8] sm:$0xff] %v1922_v15  ;;  %1759 = vmatmul.f32.gmra.mxu0 %v3706_v52  ;;  %1968 = vmatmul.f32.gmra.mxu1 %v3708_v53  ;;  %v4153_v53 = vld [vmem:[#allocation12_spill] sm:$0xff] }
 0x206   : > { %v1503_v61 = vpop.f32.mrf.mxu3 }
 0x207   : > { %v1504_v1 = vadd.f32 %v1503_v61, %v1294_v55  ;;  %v3121_v55 = vld [vmem:[#allocation3 + $0x208] sm:$0xff] }
 0x209   : > { %2693 = vst [vmem:[%s3638_s19 + $0xb0] sm:$0xff] %v1504_v1 }
 0x20a   : > { %1344 = vmatmul.f32.gmra.mxu2 %v3714_v24  ;;  %v1715_v16 = vpop.f32.mrf.mxu0  ;;  %v1924_v38 = vpop.f32.mrf.mxu1 }
 0x20b   : > { %1553 = vmatmul.f32.gmra.mxu3 %v3716_v30  ;;  %v1925_v4 = vadd.f32 %v1924_v38, %v1715_v16 }
 0x20d   : > { %v1297_v5 = vpop.f32.mrf.mxu2  ;;  %2697 = vst [vmem:[%s3638_s19 + $0xd0] sm:$0xff] %v1925_v4  ;;  %1762 = vmatmul.f32.gmra.mxu0 %v3714_v24  ;;  %1971 = vmatmul.f32.gmra.mxu1 %v3716_v30  ;;  %v4155_v30 = vld [vmem:[#allocation14_spill] sm:$0xff] }
 0x20e   : > { %v1506_v19 = vpop.f32.mrf.mxu3 }
 0x20f   : > { %v1507_v52 = vadd.f32 %v1506_v19, %v1297_v5  ;;  %v3122_v5 = vld [vmem:[#allocation3 + $0x210] sm:$0xff]  ;;  %v3123_v19 = vld [vmem:[#allocation3 + $0x218] sm:$0xff] }
 0x211   : > { %2696 = vst [vmem:[%s3638_s19 + $0xc8] sm:$0xff] %v1507_v52 }
 0x212   : > { %1347 = vmatmul.f32.gmra.mxu2 %v4153_v53  ;;  %v1718_v23 = vpop.f32.mrf.mxu0  ;;  %v1927_v46 = vpop.f32.mrf.mxu1 }
 0x213   : > { %1556 = vmatmul.f32.gmra.mxu3 %v4154_v22  ;;  %v1928_v8 = vadd.f32 %v1927_v46, %v1718_v23 }
 0x215   : > { %v1300_v9 = vpop.f32.mrf.mxu2  ;;  %2700 = vst [vmem:[%s3638_s19 + $0xe8] sm:$0xff] %v1928_v8  ;;  %1765 = vmatmul.f32.gmra.mxu0 %v4153_v53  ;;  %1974 = vmatmul.f32.gmra.mxu1 %v4154_v22 }
 0x216   : > { %v1509_v62 = vpop.f32.mrf.mxu3 }
 0x217   : > { %v1510_v24 = vadd.f32 %v1509_v62, %v1300_v9  ;;  %v3124_v9 = vld [vmem:[#allocation3 + $0x220] sm:$0xff]  ;;  %v3125_v62 = vld [vmem:[#allocation3 + $0x228] sm:$0xff] }
 0x219   : > { %2699 = vst [vmem:[%s3638_s19 + $0xe0] sm:$0xff] %v1510_v24 }
 0x21a   : > { %1350 = vmatmul.f32.gmra.mxu2 %v3734_v60  ;;  %v1721_v63 = vpop.f32.mrf.mxu0  ;;  %v1930_v33 = vpop.f32.mrf.mxu1 }
 0x21b   : > { %1559 = vmatmul.f32.gmra.mxu3 %v4155_v30  ;;  %v1931_v26 = vadd.f32 %v1930_v33, %v1721_v63 }
 0x21d   : > { %v1303_v20 = vpop.f32.mrf.mxu2  ;;  %2703 = vst [vmem:[%s3638_s19 + $0x100] sm:$0xff] %v1931_v26  ;;  %1768 = vmatmul.f32.gmra.mxu0 %v3734_v60  ;;  %1977 = vmatmul.f32.gmra.mxu1 %v4155_v30 }
 0x21e   : > { %v1512_v21 = vpop.f32.mrf.mxu3 }
 0x21f   : > { %v1513_v27 = vadd.f32 %v1512_v21, %v1303_v20  ;;  %v3126_v21 = vld [vmem:[#allocation3 + $0x230] sm:$0xff] }
 0x221   : > { %2702 = vst [vmem:[%s3638_s19 + $0xf8] sm:$0xff] %v1513_v27  ;;  %v3127_v27 = vld [vmem:[#allocation3 + $0x238] sm:$0xff] }
 0x222   : > { %1353 = vmatmul.f32.gmra.mxu2 %v4156_v47  ;;  %v1724_v18 = vpop.f32.mrf.mxu0  ;;  %v1933_v28 = vpop.f32.mrf.mxu1 }
 0x223   : > { %1562 = vmatmul.f32.gmra.mxu3 %v4157_v6  ;;  %v1934_v31 = vadd.f32 %v1933_v28, %v1724_v18 }
 0x225   : > { %v1306_v2 = vpop.f32.mrf.mxu2  ;;  %2706 = vst [vmem:[%s3638_s19 + $0x118] sm:$0xff] %v1934_v31  ;;  %1771 = vmatmul.f32.gmra.mxu0 %v4156_v47  ;;  %1980 = vmatmul.f32.gmra.mxu1 %v4157_v6 }
 0x226   : > { %v1515_v34 = vpop.f32.mrf.mxu3 }
 0x227   : > { %v1516_v60 = vadd.f32 %v1515_v34, %v1306_v2  ;;  %v3128_v34 = vld [vmem:[#allocation3 + $0x240] sm:$0xff] }
 0x229   : > { %2705 = vst [vmem:[%s3638_s19 + $0x110] sm:$0xff] %v1516_v60  ;;  %v3129_v60 = vld [vmem:[#allocation3 + $0x248] sm:$0xff] }
 0x22a   : > { %1356 = vmatmul.f32.gmra.mxu2 %v4158_v35  ;;  %v1727_v58 = vpop.f32.mrf.mxu0  ;;  %v1936_v59 = vpop.f32.mrf.mxu1 }
 0x22b   : > { %1565 = vmatmul.f32.gmra.mxu3 %v4159_v3  ;;  %v1937_v32 = vadd.f32 %v1936_v59, %v1727_v58 }
 0x22d   : > { %v1309_v50 = vpop.f32.mrf.mxu2  ;;  %2709 = vst [vmem:[%s3638_s19 + $0x130] sm:$0xff] %v1937_v32  ;;  %1774 = vmatmul.f32.gmra.mxu0 %v4158_v35  ;;  %1983 = vmatmul.f32.gmra.mxu1 %v4159_v3 }
 0x22e   : > { %v1518_v51 = vpop.f32.mrf.mxu3 }
 0x22f   : > { %v1519_v40 = vadd.f32 %v1518_v51, %v1309_v50  ;;  %v3130_v51 = vld [vmem:[#allocation3 + $0x250] sm:$0xff] }
 0x231   : > { %2708 = vst [vmem:[%s3638_s19 + $0x128] sm:$0xff] %v1519_v40  ;;  %v3131_v40 = vld [vmem:[#allocation3 + $0x258] sm:$0xff] }
 0x232   : > { %1359 = vmatmul.f32.gmra.mxu2 %v4160_v12  ;;  %v1730_v41 = vpop.f32.mrf.mxu0  ;;  %v1939_v13 = vpop.f32.mrf.mxu1 }
 0x233   : > { %1568 = vmatmul.f32.gmra.mxu3 %v4161_v17  ;;  %v1940_v10 = vadd.f32 %v1939_v13, %v1730_v41 }
 0x235   : > { %v1312_v11 = vpop.f32.mrf.mxu2  ;;  %2712 = vst [vmem:[%s3638_s19 + $0x148] sm:$0xff] %v1940_v10  ;;  %1777 = vmatmul.f32.gmra.mxu0 %v4160_v12  ;;  %1986 = vmatmul.f32.gmra.mxu1 %v4161_v17 }
 0x236   : > { %v1521_v44 = vpop.f32.mrf.mxu3 }
 0x237   : > { %v1522_v45 = vadd.f32 %v1521_v44, %v1312_v11  ;;  %v3132_v44 = vld [vmem:[#allocation3 + $0x260] sm:$0xff] }
 0x239   : > { %2711 = vst [vmem:[%s3638_s19 + $0x140] sm:$0xff] %v1522_v45  ;;  %v3133_v45 = vld [vmem:[#allocation3 + $0x268] sm:$0xff] }
 0x23a   : > { %1362 = vmatmul.f32.gmra.mxu2 %v4162_v29  ;;  %v1733_v48 = vpop.f32.mrf.mxu0  ;;  %v1942_v49 = vpop.f32.mrf.mxu1 }
 0x23b   : > { %1571 = vmatmul.f32.gmra.mxu3 %v3772_v25  ;;  %v1943_v36 = vadd.f32 %v1942_v49, %v1733_v48 }
 0x23d   : > { %v1315_v0 = vpop.f32.mrf.mxu2  ;;  %2715 = vst [vmem:[%s3638_s19 + $0x160] sm:$0xff] %v1943_v36  ;;  %1780 = vmatmul.f32.gmra.mxu0 %v4162_v29  ;;  %1989 = vmatmul.f32.gmra.mxu1 %v3772_v25  ;;  %v3120_v25 = vld [vmem:[#allocation3 + $0x200] sm:$0xff] }
 0x23e   : > { %v1524_v7 = vpop.f32.mrf.mxu3 }
 0x23f   : > { %v1525_v37 = vadd.f32 %v1524_v7, %v1315_v0 }
 0x241   : > { %2714 = vst [vmem:[%s3638_s19 + $0x158] sm:$0xff] %v1525_v37  ;;  %v3134_v37 = vld [vmem:[#allocation3 + $0x270] sm:$0xff] }
 0x242   : > { %1365 = vmatmul.f32.gmra.mxu2 %v3778_v39  ;;  %v1736_v14 = vpop.f32.mrf.mxu0  ;;  %v1945_v56 = vpop.f32.mrf.mxu1 }
 0x243   : > { %1574 = vmatmul.f32.gmra.mxu3 %v4163_v54  ;;  %v1946_v42 = vadd.f32 %v1945_v56, %v1736_v14 }
 0x245   : > { %v1318_v43 = vpop.f32.mrf.mxu2  ;;  %2718 = vst [vmem:[%s3638_s19 + $0x178] sm:$0xff] %v1946_v42  ;;  %1783 = vmatmul.f32.gmra.mxu0 %v3778_v39  ;;  %1992 = vmatmul.f32.gmra.mxu1 %v4163_v54  ;;  %v3135_v54 = vld [vmem:[#allocation3 + $0x278] sm:$0xff] }
 0x246   : > { %v1527_v57 = vpop.f32.mrf.mxu3 }
 0x247   : > { %v1528_v15 = vadd.f32 %v1527_v57, %v1318_v43 }
 0x249   : > { %2717 = vst [vmem:[%s3638_s19 + $0x170] sm:$0xff] %v1528_v15 }
 0x24a   : > { %1368 = vmatmul.f32.gmra.mxu2 %v3120_v25  ;;  %v1739_v61 = vpop.f32.mrf.mxu0  ;;  %v1948_v1 = vpop.f32.mrf.mxu1 }
 0x24b   : > { %1577 = vmatmul.f32.gmra.mxu3 %v3121_v55  ;;  %v1949_v16 = vadd.f32 %v1948_v1, %v1739_v61 }
 0x24d   : > { %v1321_v38 = vpop.f32.mrf.mxu2  ;;  %2721 = vst [vmem:[%s3638_s19 + $0x190] sm:$0xff] %v1949_v16  ;;  %1786 = vmatmul.f32.gmra.mxu0 %v3120_v25  ;;  %1995 = vmatmul.f32.gmra.mxu1 %v3121_v55  ;;  %v3136_v25 = vld [vmem:[#allocation3 + $0x280] sm:$0xff]  ;;  %v3137_v55 = vld [vmem:[#allocation3 + $0x288] sm:$0xff] }
 0x24e   : > { %v1530_v4 = vpop.f32.mrf.mxu3 }
 0x24f   : > { %v1531_v39 = vadd.f32 %v1530_v4, %v1321_v38 }
 0x251   : > { %2720 = vst [vmem:[%s3638_s19 + $0x188] sm:$0xff] %v1531_v39 }
 0x252   : > { %1371 = vmatmul.f32.gmra.mxu2 %v3122_v5  ;;  %v1742_v52 = vpop.f32.mrf.mxu0  ;;  %v1951_v53 = vpop.f32.mrf.mxu1 }
 0x253   : > { %1580 = vmatmul.f32.gmra.mxu3 %v3123_v19  ;;  %v1952_v22 = vadd.f32 %v1951_v53, %v1742_v52 }
 0x255   : > { %v1324_v23 = vpop.f32.mrf.mxu2  ;;  %2724 = vst [vmem:[%s3638_s19 + $0x1a8] sm:$0xff] %v1952_v22  ;;  %1789 = vmatmul.f32.gmra.mxu0 %v3122_v5  ;;  %1998 = vmatmul.f32.gmra.mxu1 %v3123_v19  ;;  %v3138_v5 = vld [vmem:[#allocation3 + $0x290] sm:$0xff]  ;;  %v3139_v19 = vld [vmem:[#allocation3 + $0x298] sm:$0xff] }
 0x256   : > { %v1533_v46 = vpop.f32.mrf.mxu3 }
 0x257   : > { %v1534_v8 = vadd.f32 %v1533_v46, %v1324_v23 }
 0x259   : > { %2723 = vst [vmem:[%s3638_s19 + $0x1a0] sm:$0xff] %v1534_v8 }
 0x25a   : > { %1374 = vmatmul.f32.gmra.mxu2 %v3124_v9  ;;  %v1745_v24 = vpop.f32.mrf.mxu0  ;;  %v1954_v30 = vpop.f32.mrf.mxu1 }
 0x25b   : > { %1583 = vmatmul.f32.gmra.mxu3 %v3125_v62  ;;  %v1955_v63 = vadd.f32 %v1954_v30, %v1745_v24 }
 0x25d   : > { %v1327_v33 = vpop.f32.mrf.mxu2  ;;  %2727 = vst [vmem:[%s3638_s19 + $0x1c0] sm:$0xff] %v1955_v63  ;;  %1792 = vmatmul.f32.gmra.mxu0 %v3124_v9  ;;  %2001 = vmatmul.f32.gmra.mxu1 %v3125_v62  ;;  %v3140_v9 = vld [vmem:[#allocation3 + $0x2a0] sm:$0xff]  ;;  %v3141_v62 = vld [vmem:[#allocation3 + $0x2a8] sm:$0xff] }
 0x25e   : > { %v1536_v26 = vpop.f32.mrf.mxu3 }
 0x25f   : > { %v1537_v20 = vadd.f32 %v1536_v26, %v1327_v33 }
 0x261   : > { %2726 = vst [vmem:[%s3638_s19 + $0x1b8] sm:$0xff] %v1537_v20 }
 0x262   : > { %1377 = vmatmul.f32.gmra.mxu2 %v3126_v21  ;;  %v1748_v47 = vpop.f32.mrf.mxu0  ;;  %v1957_v6 = vpop.f32.mrf.mxu1 }
 0x263   : > { %1586 = vmatmul.f32.gmra.mxu3 %v3127_v27  ;;  %v1958_v18 = vadd.f32 %v1957_v6, %v1748_v47 }
 0x265   : > { %v1330_v28 = vpop.f32.mrf.mxu2  ;;  %2730 = vst [vmem:[%s3638_s19 + $0x1d8] sm:$0xff] %v1958_v18  ;;  %1795 = vmatmul.f32.gmra.mxu0 %v3126_v21  ;;  %2004 = vmatmul.f32.gmra.mxu1 %v3127_v27  ;;  %v3142_v21 = vld [vmem:[#allocation3 + $0x2b0] sm:$0xff]  ;;  %v3143_v27 = vld [vmem:[#allocation3 + $0x2b8] sm:$0xff] }
 0x266   : > { %v1539_v31 = vpop.f32.mrf.mxu3 }
 0x267   : > { %v1540_v2 = vadd.f32 %v1539_v31, %v1330_v28 }
 0x269   : > { %2729 = vst [vmem:[%s3638_s19 + $0x1d0] sm:$0xff] %v1540_v2 }
 0x26a   : > { %1380 = vmatmul.f32.gmra.mxu2 %v3128_v34  ;;  %v1751_v35 = vpop.f32.mrf.mxu0  ;;  %v1960_v3 = vpop.f32.mrf.mxu1 }
 0x26b   : > { %1589 = vmatmul.f32.gmra.mxu3 %v3129_v60  ;;  %v1961_v58 = vadd.f32 %v1960_v3, %v1751_v35 }
 0x26d   : > { %v1333_v59 = vpop.f32.mrf.mxu2  ;;  %2733 = vst [vmem:[%s3638_s19 + $0x1f0] sm:$0xff] %v1961_v58  ;;  %1798 = vmatmul.f32.gmra.mxu0 %v3128_v34  ;;  %2007 = vmatmul.f32.gmra.mxu1 %v3129_v60  ;;  %v3144_v34 = vld [vmem:[#allocation3 + $0x2c0] sm:$0xff]  ;;  %v3145_v60 = vld [vmem:[#allocation3 + $0x2c8] sm:$0xff] }
 0x26e   : > { %v1542_v32 = vpop.f32.mrf.mxu3 }
 0x26f   : > { %v1543_v50 = vadd.f32 %v1542_v32, %v1333_v59 }
 0x271   : > { %2732 = vst [vmem:[%s3638_s19 + $0x1e8] sm:$0xff] %v1543_v50 }
 0x272   : > { %1383 = vmatmul.f32.gmra.mxu2 %v3130_v51  ;;  %v1754_v12 = vpop.f32.mrf.mxu0  ;;  %v1963_v17 = vpop.f32.mrf.mxu1 }
 0x273   : > { %1592 = vmatmul.f32.gmra.mxu3 %v3131_v40  ;;  %v1964_v41 = vadd.f32 %v1963_v17, %v1754_v12 }
 0x275   : > { %v1336_v13 = vpop.f32.mrf.mxu2  ;;  %2736 = vst [vmem:[%s3638_s19 + $0x208] sm:$0xff] %v1964_v41  ;;  %1801 = vmatmul.f32.gmra.mxu0 %v3130_v51  ;;  %2010 = vmatmul.f32.gmra.mxu1 %v3131_v40  ;;  %v3146_v51 = vld [vmem:[#allocation3 + $0x2d0] sm:$0xff]  ;;  %v3147_v40 = vld [vmem:[#allocation3 + $0x2d8] sm:$0xff] }
 0x276   : > { %v1545_v10 = vpop.f32.mrf.mxu3 }
 0x277   : > { %v1546_v11 = vadd.f32 %v1545_v10, %v1336_v13 }
 0x279   : > { %2735 = vst [vmem:[%s3638_s19 + $0x200] sm:$0xff] %v1546_v11 }
 0x27a   : > { %1386 = vmatmul.f32.gmra.mxu2 %v3132_v44  ;;  %v1757_v29 = vpop.f32.mrf.mxu0  ;;  %v1966_v48 = vpop.f32.mrf.mxu1 }
 0x27b   : > { %1595 = vmatmul.f32.gmra.mxu3 %v3133_v45  ;;  %v1967_v49 = vadd.f32 %v1966_v48, %v1757_v29 }
 0x27d   : > { %v1339_v36 = vpop.f32.mrf.mxu2  ;;  %2739 = vst [vmem:[%s3638_s19 + $0x220] sm:$0xff] %v1967_v49  ;;  %1804 = vmatmul.f32.gmra.mxu0 %v3132_v44  ;;  %2013 = vmatmul.f32.gmra.mxu1 %v3133_v45  ;;  %v3148_v44 = vld [vmem:[#allocation3 + $0x2e0] sm:$0xff]  ;;  %v3149_v45 = vld [vmem:[#allocation3 + $0x2e8] sm:$0xff] }
 0x27e   : > { %v1548_v0 = vpop.f32.mrf.mxu3 }
 0x27f   : > { %v1549_v7 = vadd.f32 %v1548_v0, %v1339_v36 }
 0x281   : > { %2738 = vst [vmem:[%s3638_s19 + $0x218] sm:$0xff] %v1549_v7 }
 0x282   : > { %1389 = vmatmul.f32.gmra.mxu2 %v3134_v37  ;;  %v1760_v14 = vpop.f32.mrf.mxu0  ;;  %v1969_v56 = vpop.f32.mrf.mxu1 }
 0x283   : > { %1598 = vmatmul.f32.gmra.mxu3 %v3135_v54  ;;  %v1970_v42 = vadd.f32 %v1969_v56, %v1760_v14 }
 0x285   : > { %v1342_v43 = vpop.f32.mrf.mxu2  ;;  %2742 = vst [vmem:[%s3638_s19 + $0x238] sm:$0xff] %v1970_v42  ;;  %1807 = vmatmul.f32.gmra.mxu0 %v3134_v37  ;;  %2016 = vmatmul.f32.gmra.mxu1 %v3135_v54  ;;  %v3150_v37 = vld [vmem:[#allocation3 + $0x2f0] sm:$0xff]  ;;  %v3151_v54 = vld [vmem:[#allocation3 + $0x2f8] sm:$0xff] }
 0x286   : > { %v1551_v57 = vpop.f32.mrf.mxu3 }
 0x287   : > { %v1552_v15 = vadd.f32 %v1551_v57, %v1342_v43 }
 0x289   : > { %2741 = vst [vmem:[%s3638_s19 + $0x230] sm:$0xff] %v1552_v15 }
 0x28a   : > { %1392 = vmatmul.f32.gmra.mxu2 %v3136_v25  ;;  %v1763_v61 = vpop.f32.mrf.mxu0  ;;  %v1972_v1 = vpop.f32.mrf.mxu1 }
 0x28b   : > { %1601 = vmatmul.f32.gmra.mxu3 %v3137_v55  ;;  %v1973_v16 = vadd.f32 %v1972_v1, %v1763_v61 }
 0x28d   : > { %v1345_v38 = vpop.f32.mrf.mxu2  ;;  %2745 = vst [vmem:[%s3638_s19 + $0x250] sm:$0xff] %v1973_v16  ;;  %1810 = vmatmul.f32.gmra.mxu0 %v3136_v25  ;;  %2019 = vmatmul.f32.gmra.mxu1 %v3137_v55  ;;  %v3152_v25 = vld [vmem:[#allocation3 + $0x300] sm:$0xff]  ;;  %v3153_v55 = vld [vmem:[#allocation3 + $0x308] sm:$0xff] }
 0x28e   : > { %v1554_v4 = vpop.f32.mrf.mxu3 }
 0x28f   : > { %v1555_v39 = vadd.f32 %v1554_v4, %v1345_v38 }
 0x291   : > { %2744 = vst [vmem:[%s3638_s19 + $0x248] sm:$0xff] %v1555_v39 }
 0x292   : > { %1395 = vmatmul.f32.gmra.mxu2 %v3138_v5  ;;  %v1766_v52 = vpop.f32.mrf.mxu0  ;;  %v1975_v53 = vpop.f32.mrf.mxu1 }
 0x293   : > { %1604 = vmatmul.f32.gmra.mxu3 %v3139_v19  ;;  %v1976_v22 = vadd.f32 %v1975_v53, %v1766_v52 }
 0x295   : > { %v1348_v23 = vpop.f32.mrf.mxu2  ;;  %2748 = vst [vmem:[%s3638_s19 + $0x268] sm:$0xff] %v1976_v22  ;;  %1813 = vmatmul.f32.gmra.mxu0 %v3138_v5  ;;  %2022 = vmatmul.f32.gmra.mxu1 %v3139_v19  ;;  %v3154_v5 = vld [vmem:[#allocation3 + $0x310] sm:$0xff]  ;;  %v3155_v19 = vld [vmem:[#allocation3 + $0x318] sm:$0xff] }
 0x296   : > { %v1557_v46 = vpop.f32.mrf.mxu3 }
 0x297   : > { %v1558_v8 = vadd.f32 %v1557_v46, %v1348_v23 }
 0x299   : > { %2747 = vst [vmem:[%s3638_s19 + $0x260] sm:$0xff] %v1558_v8 }
 0x29a   : > { %1398 = vmatmul.f32.gmra.mxu2 %v3140_v9  ;;  %v1769_v24 = vpop.f32.mrf.mxu0  ;;  %v1978_v30 = vpop.f32.mrf.mxu1 }
 0x29b   : > { %1607 = vmatmul.f32.gmra.mxu3 %v3141_v62  ;;  %v1979_v63 = vadd.f32 %v1978_v30, %v1769_v24 }
 0x29d   : > { %v1351_v33 = vpop.f32.mrf.mxu2  ;;  %2751 = vst [vmem:[%s3638_s19 + $0x280] sm:$0xff] %v1979_v63  ;;  %1816 = vmatmul.f32.gmra.mxu0 %v3140_v9  ;;  %2025 = vmatmul.f32.gmra.mxu1 %v3141_v62  ;;  %v3156_v9 = vld [vmem:[#allocation3 + $0x320] sm:$0xff]  ;;  %v3157_v62 = vld [vmem:[#allocation3 + $0x328] sm:$0xff] }
 0x29e   : > { %v1560_v26 = vpop.f32.mrf.mxu3 }
 0x29f   : > { %v1561_v20 = vadd.f32 %v1560_v26, %v1351_v33 }
 0x2a1   : > { %2750 = vst [vmem:[%s3638_s19 + $0x278] sm:$0xff] %v1561_v20 }
 0x2a2   : > { %1401 = vmatmul.f32.gmra.mxu2 %v3142_v21  ;;  %v1772_v47 = vpop.f32.mrf.mxu0  ;;  %v1981_v6 = vpop.f32.mrf.mxu1 }
 0x2a3   : > { %1610 = vmatmul.f32.gmra.mxu3 %v3143_v27  ;;  %v1982_v18 = vadd.f32 %v1981_v6, %v1772_v47 }
 0x2a5   : > { %v1354_v28 = vpop.f32.mrf.mxu2  ;;  %2754 = vst [vmem:[%s3638_s19 + $0x298] sm:$0xff] %v1982_v18  ;;  %1819 = vmatmul.f32.gmra.mxu0 %v3142_v21  ;;  %2028 = vmatmul.f32.gmra.mxu1 %v3143_v27  ;;  %v3158_v21 = vld [vmem:[#allocation3 + $0x330] sm:$0xff]  ;;  %v3159_v27 = vld [vmem:[#allocation3 + $0x338] sm:$0xff] }
 0x2a6   : > { %v1563_v31 = vpop.f32.mrf.mxu3 }
 0x2a7   : > { %v1564_v2 = vadd.f32 %v1563_v31, %v1354_v28 }
 0x2a9   : > { %2753 = vst [vmem:[%s3638_s19 + $0x290] sm:$0xff] %v1564_v2 }
 0x2aa   : > { %1404 = vmatmul.f32.gmra.mxu2 %v3144_v34  ;;  %v1775_v35 = vpop.f32.mrf.mxu0  ;;  %v1984_v3 = vpop.f32.mrf.mxu1 }
 0x2ab   : > { %1613 = vmatmul.f32.gmra.mxu3 %v3145_v60  ;;  %v1985_v58 = vadd.f32 %v1984_v3, %v1775_v35 }
 0x2ad   : > { %v1357_v59 = vpop.f32.mrf.mxu2  ;;  %2757 = vst [vmem:[%s3638_s19 + $0x2b0] sm:$0xff] %v1985_v58  ;;  %1822 = vmatmul.f32.gmra.mxu0 %v3144_v34  ;;  %2031 = vmatmul.f32.gmra.mxu1 %v3145_v60  ;;  %v3160_v34 = vld [vmem:[#allocation3 + $0x340] sm:$0xff]  ;;  %v3161_v60 = vld [vmem:[#allocation3 + $0x348] sm:$0xff] }
 0x2ae   : > { %v1566_v32 = vpop.f32.mrf.mxu3 }
 0x2af   : > { %v1567_v50 = vadd.f32 %v1566_v32, %v1357_v59 }
 0x2b1   : > { %2756 = vst [vmem:[%s3638_s19 + $0x2a8] sm:$0xff] %v1567_v50 }
 0x2b2   : > { %1407 = vmatmul.f32.gmra.mxu2 %v3146_v51  ;;  %v1778_v12 = vpop.f32.mrf.mxu0  ;;  %v1987_v17 = vpop.f32.mrf.mxu1 }
 0x2b3   : > { %1616 = vmatmul.f32.gmra.mxu3 %v3147_v40  ;;  %v1988_v41 = vadd.f32 %v1987_v17, %v1778_v12 }
 0x2b5   : > { %v1360_v13 = vpop.f32.mrf.mxu2  ;;  %2760 = vst [vmem:[%s3638_s19 + $0x2c8] sm:$0xff] %v1988_v41  ;;  %1825 = vmatmul.f32.gmra.mxu0 %v3146_v51  ;;  %2034 = vmatmul.f32.gmra.mxu1 %v3147_v40  ;;  %v3162_v51 = vld [vmem:[#allocation3 + $0x350] sm:$0xff]  ;;  %v3163_v40 = vld [vmem:[#allocation3 + $0x358] sm:$0xff] }
 0x2b6   : > { %v1569_v10 = vpop.f32.mrf.mxu3 }
 0x2b7   : > { %v1570_v11 = vadd.f32 %v1569_v10, %v1360_v13 }
 0x2b9   : > { %2759 = vst [vmem:[%s3638_s19 + $0x2c0] sm:$0xff] %v1570_v11 }
 0x2ba   : > { %1410 = vmatmul.f32.gmra.mxu2 %v3148_v44  ;;  %v1781_v29 = vpop.f32.mrf.mxu0  ;;  %v1990_v48 = vpop.f32.mrf.mxu1 }
 0x2bb   : > { %1619 = vmatmul.f32.gmra.mxu3 %v3149_v45  ;;  %v1991_v49 = vadd.f32 %v1990_v48, %v1781_v29 }
 0x2bd   : > { %v1363_v36 = vpop.f32.mrf.mxu2  ;;  %2763 = vst [vmem:[%s3638_s19 + $0x2e0] sm:$0xff] %v1991_v49  ;;  %1828 = vmatmul.f32.gmra.mxu0 %v3148_v44  ;;  %2037 = vmatmul.f32.gmra.mxu1 %v3149_v45  ;;  %v3164_v44 = vld [vmem:[#allocation3 + $0x360] sm:$0xff]  ;;  %v3165_v45 = vld [vmem:[#allocation3 + $0x368] sm:$0xff] }
 0x2be   : > { %v1572_v0 = vpop.f32.mrf.mxu3 }
 0x2bf   : > { %v1573_v7 = vadd.f32 %v1572_v0, %v1363_v36 }
 0x2c1   : > { %2762 = vst [vmem:[%s3638_s19 + $0x2d8] sm:$0xff] %v1573_v7 }
 0x2c2   : > { %1413 = vmatmul.f32.gmra.mxu2 %v3150_v37  ;;  %v1784_v14 = vpop.f32.mrf.mxu0  ;;  %v1993_v56 = vpop.f32.mrf.mxu1 }
 0x2c3   : > { %1622 = vmatmul.f32.gmra.mxu3 %v3151_v54  ;;  %v1994_v42 = vadd.f32 %v1993_v56, %v1784_v14 }
 0x2c5   : > { %v1366_v43 = vpop.f32.mrf.mxu2  ;;  %2766 = vst [vmem:[%s3638_s19 + $0x2f8] sm:$0xff] %v1994_v42  ;;  %1831 = vmatmul.f32.gmra.mxu0 %v3150_v37  ;;  %2040 = vmatmul.f32.gmra.mxu1 %v3151_v54  ;;  %v3166_v37 = vld [vmem:[#allocation3 + $0x370] sm:$0xff]  ;;  %v3167_v54 = vld [vmem:[#allocation3 + $0x378] sm:$0xff] }
 0x2c6   : > { %v1575_v57 = vpop.f32.mrf.mxu3 }
 0x2c7   : > { %v1576_v15 = vadd.f32 %v1575_v57, %v1366_v43 }
 0x2c9   : > { %2765 = vst [vmem:[%s3638_s19 + $0x2f0] sm:$0xff] %v1576_v15 }
 0x2ca   : > { %1416 = vmatmul.f32.gmra.mxu2 %v3152_v25  ;;  %v1787_v61 = vpop.f32.mrf.mxu0  ;;  %v1996_v1 = vpop.f32.mrf.mxu1 }
 0x2cb   : > { %1625 = vmatmul.f32.gmra.mxu3 %v3153_v55  ;;  %v1997_v16 = vadd.f32 %v1996_v1, %v1787_v61 }
 0x2cd   : > { %v1369_v38 = vpop.f32.mrf.mxu2  ;;  %2769 = vst [vmem:[%s3638_s19 + $0x310] sm:$0xff] %v1997_v16  ;;  %1834 = vmatmul.f32.gmra.mxu0 %v3152_v25  ;;  %2043 = vmatmul.f32.gmra.mxu1 %v3153_v55  ;;  %v3168_v25 = vld [vmem:[#allocation3 + $0x380] sm:$0xff]  ;;  %v3169_v55 = vld [vmem:[#allocation3 + $0x388] sm:$0xff] }
 0x2ce   : > { %v1578_v4 = vpop.f32.mrf.mxu3 }
 0x2cf   : > { %v1579_v39 = vadd.f32 %v1578_v4, %v1369_v38 }
 0x2d1   : > { %2768 = vst [vmem:[%s3638_s19 + $0x308] sm:$0xff] %v1579_v39 }
 0x2d2   : > { %1419 = vmatmul.f32.gmra.mxu2 %v3154_v5  ;;  %v1790_v52 = vpop.f32.mrf.mxu0  ;;  %v1999_v53 = vpop.f32.mrf.mxu1 }
 0x2d3   : > { %1628 = vmatmul.f32.gmra.mxu3 %v3155_v19  ;;  %v2000_v22 = vadd.f32 %v1999_v53, %v1790_v52 }
 0x2d5   : > { %v1372_v23 = vpop.f32.mrf.mxu2  ;;  %2772 = vst [vmem:[%s3638_s19 + $0x328] sm:$0xff] %v2000_v22  ;;  %1837 = vmatmul.f32.gmra.mxu0 %v3154_v5  ;;  %2046 = vmatmul.f32.gmra.mxu1 %v3155_v19  ;;  %v3170_v5 = vld [vmem:[#allocation3 + $0x390] sm:$0xff]  ;;  %v3171_v19 = vld [vmem:[#allocation3 + $0x398] sm:$0xff] }
 0x2d6   : > { %v1581_v46 = vpop.f32.mrf.mxu3 }
 0x2d7   : > { %v1582_v8 = vadd.f32 %v1581_v46, %v1372_v23 }
 0x2d9   : > { %2771 = vst [vmem:[%s3638_s19 + $0x320] sm:$0xff] %v1582_v8 }
 0x2da   : > { %1422 = vmatmul.f32.gmra.mxu2 %v3156_v9  ;;  %v1793_v24 = vpop.f32.mrf.mxu0  ;;  %v2002_v30 = vpop.f32.mrf.mxu1 }
 0x2db   : > { %1631 = vmatmul.f32.gmra.mxu3 %v3157_v62  ;;  %v2003_v63 = vadd.f32 %v2002_v30, %v1793_v24 }
 0x2dd   : > { %v1375_v33 = vpop.f32.mrf.mxu2  ;;  %2775 = vst [vmem:[%s3638_s19 + $0x340] sm:$0xff] %v2003_v63  ;;  %1840 = vmatmul.f32.gmra.mxu0 %v3156_v9  ;;  %2049 = vmatmul.f32.gmra.mxu1 %v3157_v62  ;;  %v3172_v9 = vld [vmem:[#allocation3 + $0x3a0] sm:$0xff]  ;;  %v3173_v62 = vld [vmem:[#allocation3 + $0x3a8] sm:$0xff] }
 0x2de   : > { %v1584_v26 = vpop.f32.mrf.mxu3 }
 0x2df   : > { %v1585_v20 = vadd.f32 %v1584_v26, %v1375_v33 }
 0x2e1   : > { %2774 = vst [vmem:[%s3638_s19 + $0x338] sm:$0xff] %v1585_v20 }
 0x2e2   : > { %1425 = vmatmul.f32.gmra.mxu2 %v3158_v21  ;;  %v1796_v47 = vpop.f32.mrf.mxu0  ;;  %v2005_v6 = vpop.f32.mrf.mxu1 }
 0x2e3   : > { %1634 = vmatmul.f32.gmra.mxu3 %v3159_v27  ;;  %v2006_v18 = vadd.f32 %v2005_v6, %v1796_v47 }
 0x2e5   : > { %v1378_v28 = vpop.f32.mrf.mxu2  ;;  %2778 = vst [vmem:[%s3638_s19 + $0x358] sm:$0xff] %v2006_v18  ;;  %1843 = vmatmul.f32.gmra.mxu0 %v3158_v21  ;;  %2052 = vmatmul.f32.gmra.mxu1 %v3159_v27  ;;  %v3174_v21 = vld [vmem:[#allocation3 + $0x3b0] sm:$0xff]  ;;  %v3175_v27 = vld [vmem:[#allocation3 + $0x3b8] sm:$0xff] }
 0x2e6   : > { %v1587_v31 = vpop.f32.mrf.mxu3 }
 0x2e7   : > { %v1588_v2 = vadd.f32 %v1587_v31, %v1378_v28 }
 0x2e9   : > { %2777 = vst [vmem:[%s3638_s19 + $0x350] sm:$0xff] %v1588_v2 }
 0x2ea   : > { %1428 = vmatmul.f32.gmra.mxu2 %v3160_v34  ;;  %v1799_v35 = vpop.f32.mrf.mxu0  ;;  %v2008_v3 = vpop.f32.mrf.mxu1 }
 0x2eb   : > { %1637 = vmatmul.f32.gmra.mxu3 %v3161_v60  ;;  %v2009_v58 = vadd.f32 %v2008_v3, %v1799_v35 }
 0x2ed   : > { %v1381_v59 = vpop.f32.mrf.mxu2  ;;  %2781 = vst [vmem:[%s3638_s19 + $0x370] sm:$0xff] %v2009_v58  ;;  %1846 = vmatmul.f32.gmra.mxu0 %v3160_v34  ;;  %2055 = vmatmul.f32.gmra.mxu1 %v3161_v60  ;;  %v3176_v34 = vld [vmem:[#allocation3 + $0x3c0] sm:$0xff]  ;;  %v3177_v60 = vld [vmem:[#allocation3 + $0x3c8] sm:$0xff] }
 0x2ee   : > { %v1590_v32 = vpop.f32.mrf.mxu3 }
 0x2ef   : > { %v1591_v50 = vadd.f32 %v1590_v32, %v1381_v59 }
 0x2f1   : > { %2780 = vst [vmem:[%s3638_s19 + $0x368] sm:$0xff] %v1591_v50 }
 0x2f2   : > { %1431 = vmatmul.f32.gmra.mxu2 %v3162_v51  ;;  %v1802_v12 = vpop.f32.mrf.mxu0  ;;  %v2011_v17 = vpop.f32.mrf.mxu1 }
 0x2f3   : > { %1640 = vmatmul.f32.gmra.mxu3 %v3163_v40  ;;  %v2012_v41 = vadd.f32 %v2011_v17, %v1802_v12 }
 0x2f5   : > { %v1384_v13 = vpop.f32.mrf.mxu2  ;;  %2784 = vst [vmem:[%s3638_s19 + $0x388] sm:$0xff] %v2012_v41  ;;  %1849 = vmatmul.f32.gmra.mxu0 %v3162_v51  ;;  %2058 = vmatmul.f32.gmra.mxu1 %v3163_v40  ;;  %v3178_v51 = vld [vmem:[#allocation3 + $0x3d0] sm:$0xff]  ;;  %v3179_v40 = vld [vmem:[#allocation3 + $0x3d8] sm:$0xff] }
 0x2f6   : > { %v1593_v10 = vpop.f32.mrf.mxu3 }
 0x2f7   : > { %v1594_v11 = vadd.f32 %v1593_v10, %v1384_v13 }
 0x2f9   : > { %2783 = vst [vmem:[%s3638_s19 + $0x380] sm:$0xff] %v1594_v11 }
 0x2fa   : > { %1434 = vmatmul.f32.gmra.mxu2 %v3164_v44  ;;  %v1805_v29 = vpop.f32.mrf.mxu0  ;;  %v2014_v48 = vpop.f32.mrf.mxu1 }
 0x2fb   : > { %1643 = vmatmul.f32.gmra.mxu3 %v3165_v45  ;;  %v2015_v49 = vadd.f32 %v2014_v48, %v1805_v29 }
 0x2fd   : > { %v1387_v36 = vpop.f32.mrf.mxu2  ;;  %2787 = vst [vmem:[%s3638_s19 + $0x3a0] sm:$0xff] %v2015_v49  ;;  %1852 = vmatmul.f32.gmra.mxu0 %v3164_v44  ;;  %2061 = vmatmul.f32.gmra.mxu1 %v3165_v45  ;;  %v3180_v44 = vld [vmem:[#allocation3 + $0x3e0] sm:$0xff]  ;;  %v3181_v45 = vld [vmem:[#allocation3 + $0x3e8] sm:$0xff] }
 0x2fe   : > { %v1596_v0 = vpop.f32.mrf.mxu3 }
 0x2ff   : > { %v1597_v7 = vadd.f32 %v1596_v0, %v1387_v36 }
 0x301   : > { %2786 = vst [vmem:[%s3638_s19 + $0x398] sm:$0xff] %v1597_v7 }
 0x302   : > { %1437 = vmatmul.f32.gmra.mxu2 %v3166_v37  ;;  %v1808_v14 = vpop.f32.mrf.mxu0  ;;  %v2017_v56 = vpop.f32.mrf.mxu1 }
 0x303   : > { %1646 = vmatmul.f32.gmra.mxu3 %v3167_v54  ;;  %v2018_v42 = vadd.f32 %v2017_v56, %v1808_v14 }
 0x305   : > { %v1390_v43 = vpop.f32.mrf.mxu2  ;;  %2790 = vst [vmem:[%s3638_s19 + $0x3b8] sm:$0xff] %v2018_v42  ;;  %1855 = vmatmul.f32.gmra.mxu0 %v3166_v37  ;;  %2064 = vmatmul.f32.gmra.mxu1 %v3167_v54  ;;  %v3182_v37 = vld [vmem:[#allocation3 + $0x3f0] sm:$0xff]  ;;  %v3183_v54 = vld [vmem:[#allocation3 + $0x3f8] sm:$0xff] }
 0x306   : > { %v1599_v57 = vpop.f32.mrf.mxu3 }
 0x307   : > { %v1600_v15 = vadd.f32 %v1599_v57, %v1390_v43 }
 0x309   : > { %2789 = vst [vmem:[%s3638_s19 + $0x3b0] sm:$0xff] %v1600_v15 }
 0x30a   : > { %1440 = vmatmul.f32.gmra.mxu2 %v3168_v25  ;;  %v1811_v61 = vpop.f32.mrf.mxu0  ;;  %v2020_v1 = vpop.f32.mrf.mxu1 }
 0x30b   : > { %1649 = vmatmul.f32.gmra.mxu3 %v3169_v55  ;;  %v2021_v16 = vadd.f32 %v2020_v1, %v1811_v61 }
 0x30d   : > { %v1393_v38 = vpop.f32.mrf.mxu2  ;;  %2793 = vst [vmem:[%s3638_s19 + $0x3d0] sm:$0xff] %v2021_v16  ;;  %1858 = vmatmul.f32.gmra.mxu0 %v3168_v25  ;;  %2067 = vmatmul.f32.gmra.mxu1 %v3169_v55 }
 0x30e   : > { %v1602_v4 = vpop.f32.mrf.mxu3 }
 0x30f   : > { %v1603_v39 = vadd.f32 %v1602_v4, %v1393_v38 }
 0x311   : > { %2792 = vst [vmem:[%s3638_s19 + $0x3c8] sm:$0xff] %v1603_v39 }
 0x312   : > { %1443 = vmatmul.f32.gmra.mxu2 %v3170_v5  ;;  %v1814_v52 = vpop.f32.mrf.mxu0  ;;  %v2023_v53 = vpop.f32.mrf.mxu1 }
 0x313   : > { %1652 = vmatmul.f32.gmra.mxu3 %v3171_v19  ;;  %v2024_v22 = vadd.f32 %v2023_v53, %v1814_v52 }
 0x315   : > { %v1396_v23 = vpop.f32.mrf.mxu2  ;;  %2796 = vst [vmem:[%s3638_s19 + $0x3e8] sm:$0xff] %v2024_v22  ;;  %1861 = vmatmul.f32.gmra.mxu0 %v3170_v5  ;;  %2070 = vmatmul.f32.gmra.mxu1 %v3171_v19 }
 0x316   : > { %v1605_v46 = vpop.f32.mrf.mxu3 }
 0x317   : > { %v1606_v8 = vadd.f32 %v1605_v46, %v1396_v23 }
 0x319   : > { %2795 = vst [vmem:[%s3638_s19 + $0x3e0] sm:$0xff] %v1606_v8 }
 0x31a   : > { %1446 = vmatmul.f32.gmra.mxu2 %v3172_v9  ;;  %v1817_v24 = vpop.f32.mrf.mxu0  ;;  %v2026_v30 = vpop.f32.mrf.mxu1 }
 0x31b   : > { %1655 = vmatmul.f32.gmra.mxu3 %v3173_v62  ;;  %v2027_v63 = vadd.f32 %v2026_v30, %v1817_v24 }
 0x31d   : > { %v1399_v33 = vpop.f32.mrf.mxu2  ;;  %2799 = vst [vmem:[%s3638_s19 + $0x400] sm:$0xff] %v2027_v63  ;;  %1864 = vmatmul.f32.gmra.mxu0 %v3172_v9  ;;  %2073 = vmatmul.f32.gmra.mxu1 %v3173_v62 }
 0x31e   : > { %v1608_v26 = vpop.f32.mrf.mxu3 }
 0x31f   : > { %v1609_v20 = vadd.f32 %v1608_v26, %v1399_v33 }
 0x321   : > { %2798 = vst [vmem:[%s3638_s19 + $0x3f8] sm:$0xff] %v1609_v20 }
 0x322   : > { %1449 = vmatmul.f32.gmra.mxu2 %v3174_v21  ;;  %v1820_v47 = vpop.f32.mrf.mxu0  ;;  %v2029_v6 = vpop.f32.mrf.mxu1 }
 0x323   : > { %1658 = vmatmul.f32.gmra.mxu3 %v3175_v27  ;;  %v2030_v18 = vadd.f32 %v2029_v6, %v1820_v47 }
 0x325   : > { %v1402_v28 = vpop.f32.mrf.mxu2  ;;  %2802 = vst [vmem:[%s3638_s19 + $0x418] sm:$0xff] %v2030_v18  ;;  %1867 = vmatmul.f32.gmra.mxu0 %v3174_v21  ;;  %2076 = vmatmul.f32.gmra.mxu1 %v3175_v27 }
 0x326   : > { %v1611_v31 = vpop.f32.mrf.mxu3 }
 0x327   : > { %v1612_v2 = vadd.f32 %v1611_v31, %v1402_v28 }
 0x329   : > { %2801 = vst [vmem:[%s3638_s19 + $0x410] sm:$0xff] %v1612_v2 }
 0x32a   : > { %1452 = vmatmul.f32.gmra.mxu2 %v3176_v34  ;;  %v1823_v35 = vpop.f32.mrf.mxu0  ;;  %v2032_v3 = vpop.f32.mrf.mxu1 }
 0x32b   : > { %1661 = vmatmul.f32.gmra.mxu3 %v3177_v60  ;;  %v2033_v58 = vadd.f32 %v2032_v3, %v1823_v35 }
 0x32d   : > { %v1405_v59 = vpop.f32.mrf.mxu2  ;;  %2805 = vst [vmem:[%s3638_s19 + $0x430] sm:$0xff] %v2033_v58  ;;  %1870 = vmatmul.f32.gmra.mxu0 %v3176_v34  ;;  %2079 = vmatmul.f32.gmra.mxu1 %v3177_v60 }
 0x32e   : > { %v1614_v32 = vpop.f32.mrf.mxu3 }
 0x32f   : > { %v1615_v50 = vadd.f32 %v1614_v32, %v1405_v59 }
 0x331   : > { %2804 = vst [vmem:[%s3638_s19 + $0x428] sm:$0xff] %v1615_v50 }
 0x332   : > { %1455 = vmatmul.f32.gmra.mxu2 %v3178_v51  ;;  %v1826_v12 = vpop.f32.mrf.mxu0  ;;  %v2035_v17 = vpop.f32.mrf.mxu1 }
 0x333   : > { %1664 = vmatmul.f32.gmra.mxu3 %v3179_v40  ;;  %v2036_v41 = vadd.f32 %v2035_v17, %v1826_v12 }
 0x335   : > { %v1408_v13 = vpop.f32.mrf.mxu2  ;;  %2808 = vst [vmem:[%s3638_s19 + $0x448] sm:$0xff] %v2036_v41  ;;  %1873 = vmatmul.f32.gmra.mxu0 %v3178_v51  ;;  %2082 = vmatmul.f32.gmra.mxu1 %v3179_v40 }
 0x336   : > { %v1617_v10 = vpop.f32.mrf.mxu3 }
 0x337   : > { %v1618_v11 = vadd.f32 %v1617_v10, %v1408_v13 }
 0x339   : > { %2807 = vst [vmem:[%s3638_s19 + $0x440] sm:$0xff] %v1618_v11 }
 0x33a   : > { %1458 = vmatmul.f32.gmra.mxu2 %v3180_v44  ;;  %v1829_v29 = vpop.f32.mrf.mxu0  ;;  %v2038_v48 = vpop.f32.mrf.mxu1 }
 0x33b   : > { %1667 = vmatmul.f32.gmra.mxu3 %v3181_v45  ;;  %v2039_v49 = vadd.f32 %v2038_v48, %v1829_v29 }
 0x33d   : > { %v1411_v36 = vpop.f32.mrf.mxu2  ;;  %2811 = vst [vmem:[%s3638_s19 + $0x460] sm:$0xff] %v2039_v49  ;;  %1876 = vmatmul.f32.gmra.mxu0 %v3180_v44  ;;  %2085 = vmatmul.f32.gmra.mxu1 %v3181_v45 }
 0x33e   : > { %v1620_v0 = vpop.f32.mrf.mxu3 }
 0x33f   : > { %v1621_v7 = vadd.f32 %v1620_v0, %v1411_v36 }
 0x341   : > { %2810 = vst [vmem:[%s3638_s19 + $0x458] sm:$0xff] %v1621_v7 }
 0x342   : > { %1461 = vmatmul.f32.gmra.mxu2 %v3182_v37  ;;  %v1832_v14 = vpop.f32.mrf.mxu0  ;;  %v2041_v56 = vpop.f32.mrf.mxu1 }
 0x343   : > { %1670 = vmatmul.f32.gmra.mxu3 %v3183_v54  ;;  %v2042_v42 = vadd.f32 %v2041_v56, %v1832_v14 }
 0x345   : > { %v1414_v43 = vpop.f32.mrf.mxu2  ;;  %2814 = vst [vmem:[%s3638_s19 + $0x478] sm:$0xff] %v2042_v42  ;;  %1879 = vmatmul.f32.gmra.mxu0 %v3182_v37  ;;  %2088 = vmatmul.f32.gmra.mxu1 %v3183_v54 }
 0x346   : > { %v1623_v57 = vpop.f32.mrf.mxu3 }
 0x347   : > { %v1624_v15 = vadd.f32 %v1623_v57, %v1414_v43 }
 0x349   : > { %2813 = vst [vmem:[%s3638_s19 + $0x470] sm:$0xff] %v1624_v15 }
 0x34a   : > { %v1835_v25 = vpop.f32.mrf.mxu0  ;;  %v2044_v55 = vpop.f32.mrf.mxu1 }
 0x34b   : > { %v2045_v61 = vadd.f32 %v2044_v55, %v1835_v25 }
 0x34d   : > { %v1417_v1 = vpop.f32.mrf.mxu2  ;;  %2817 = vst [vmem:[%s3638_s19 + $0x490] sm:$0xff] %v2045_v61 }
 0x34e   : > { %v1626_v16 = vpop.f32.mrf.mxu3 }
 0x34f   : > { %v1627_v38 = vadd.f32 %v1626_v16, %v1417_v1 }
 0x351   : > { %2816 = vst [vmem:[%s3638_s19 + $0x488] sm:$0xff] %v1627_v38 }
 0x352   : > { %v1838_v4 = vpop.f32.mrf.mxu0  ;;  %v2047_v39 = vpop.f32.mrf.mxu1 }
 0x353   : > { %v2048_v5 = vadd.f32 %v2047_v39, %v1838_v4 }
 0x355   : > { %v1420_v19 = vpop.f32.mrf.mxu2  ;;  %2820 = vst [vmem:[%s3638_s19 + $0x4a8] sm:$0xff] %v2048_v5 }
 0x356   : > { %v1629_v52 = vpop.f32.mrf.mxu3 }
 0x357   : > { %v1630_v53 = vadd.f32 %v1629_v52, %v1420_v19 }
 0x359   : > { %2819 = vst [vmem:[%s3638_s19 + $0x4a0] sm:$0xff] %v1630_v53 }
 0x35a   : > { %v1841_v22 = vpop.f32.mrf.mxu0  ;;  %v2050_v23 = vpop.f32.mrf.mxu1 }
 0x35b   : > { %v2051_v46 = vadd.f32 %v2050_v23, %v1841_v22 }
 0x35d   : > { %v1423_v8 = vpop.f32.mrf.mxu2  ;;  %2823 = vst [vmem:[%s3638_s19 + $0x4c0] sm:$0xff] %v2051_v46 }
 0x35e   : > { %v1632_v9 = vpop.f32.mrf.mxu3 }
 0x35f   : > { %v1633_v62 = vadd.f32 %v1632_v9, %v1423_v8 }
 0x361   : > { %2822 = vst [vmem:[%s3638_s19 + $0x4b8] sm:$0xff] %v1633_v62 }
 0x362   : > { %v1844_v24 = vpop.f32.mrf.mxu0  ;;  %v2053_v30 = vpop.f32.mrf.mxu1 }
 0x363   : > { %v2054_v63 = vadd.f32 %v2053_v30, %v1844_v24 }
 0x365   : > { %v1426_v33 = vpop.f32.mrf.mxu2  ;;  %2826 = vst [vmem:[%s3638_s19 + $0x4d8] sm:$0xff] %v2054_v63 }
 0x366   : > { %v1635_v26 = vpop.f32.mrf.mxu3 }
 0x367   : > { %v1636_v20 = vadd.f32 %v1635_v26, %v1426_v33 }
 0x369   : > { %2825 = vst [vmem:[%s3638_s19 + $0x4d0] sm:$0xff] %v1636_v20 }
 0x36a   : > { %v1847_v21 = vpop.f32.mrf.mxu0  ;;  %v2056_v27 = vpop.f32.mrf.mxu1 }
 0x36b   : > { %v2057_v47 = vadd.f32 %v2056_v27, %v1847_v21 }
 0x36d   : > { %v1429_v6 = vpop.f32.mrf.mxu2  ;;  %2829 = vst [vmem:[%s3638_s19 + $0x4f0] sm:$0xff] %v2057_v47 }
 0x36e   : > { %v1638_v18 = vpop.f32.mrf.mxu3 }
 0x36f   : > { %v1639_v28 = vadd.f32 %v1638_v18, %v1429_v6 }
 0x371   : > { %2828 = vst [vmem:[%s3638_s19 + $0x4e8] sm:$0xff] %v1639_v28 }
 0x372   : > { %v1850_v31 = vpop.f32.mrf.mxu0  ;;  %v2059_v2 = vpop.f32.mrf.mxu1 }
 0x373   : > { %v2060_v34 = vadd.f32 %v2059_v2, %v1850_v31 }
 0x375   : > { %v1432_v60 = vpop.f32.mrf.mxu2  ;;  %2832 = vst [vmem:[%s3638_s19 + $0x508] sm:$0xff] %v2060_v34 }
 0x376   : > { %v1641_v35 = vpop.f32.mrf.mxu3 }
 0x377   : > { %v1642_v3 = vadd.f32 %v1641_v35, %v1432_v60 }
 0x379   : > { %2831 = vst [vmem:[%s3638_s19 + $0x500] sm:$0xff] %v1642_v3 }
 0x37a   : > { %v1853_v58 = vpop.f32.mrf.mxu0  ;;  %v2062_v59 = vpop.f32.mrf.mxu1 }
 0x37b   : > { %v2063_v32 = vadd.f32 %v2062_v59, %v1853_v58 }
 0x37d   : > { %v1435_v50 = vpop.f32.mrf.mxu2  ;;  %2835 = vst [vmem:[%s3638_s19 + $0x520] sm:$0xff] %v2063_v32 }
 0x37e   : > { %v1644_v51 = vpop.f32.mrf.mxu3 }
 0x37f   : > { %v1645_v40 = vadd.f32 %v1644_v51, %v1435_v50 }
 0x381   : > { %2834 = vst [vmem:[%s3638_s19 + $0x518] sm:$0xff] %v1645_v40 }
 0x382   : > { %v1856_v12 = vpop.f32.mrf.mxu0  ;;  %v2065_v17 = vpop.f32.mrf.mxu1 }
 0x383   : > { %v2066_v41 = vadd.f32 %v2065_v17, %v1856_v12 }
 0x385   : > { %v1438_v13 = vpop.f32.mrf.mxu2  ;;  %2838 = vst [vmem:[%s3638_s19 + $0x538] sm:$0xff] %v2066_v41 }
 0x386   : > { %v1647_v10 = vpop.f32.mrf.mxu3 }
 0x387   : > { %v1648_v11 = vadd.f32 %v1647_v10, %v1438_v13 }
 0x389   : > { %2837 = vst [vmem:[%s3638_s19 + $0x530] sm:$0xff] %v1648_v11 }
 0x38a   : > { %v1859_v44 = vpop.f32.mrf.mxu0  ;;  %v2068_v45 = vpop.f32.mrf.mxu1 }
 0x38b   : > { %v2069_v29 = vadd.f32 %v2068_v45, %v1859_v44 }
 0x38d   : > { %v1441_v48 = vpop.f32.mrf.mxu2  ;;  %2841 = vst [vmem:[%s3638_s19 + $0x550] sm:$0xff] %v2069_v29 }
 0x38e   : > { %v1650_v49 = vpop.f32.mrf.mxu3 }
 0x38f   : > { %v1651_v36 = vadd.f32 %v1650_v49, %v1441_v48 }
 0x391   : > { %2840 = vst [vmem:[%s3638_s19 + $0x548] sm:$0xff] %v1651_v36 }
 0x392   : > { %v1862_v0 = vpop.f32.mrf.mxu0  ;;  %v2071_v7 = vpop.f32.mrf.mxu1 }
 0x393   : > { %v2072_v37 = vadd.f32 %v2071_v7, %v1862_v0 }
 0x395   : > { %v1444_v54 = vpop.f32.mrf.mxu2  ;;  %2844 = vst [vmem:[%s3638_s19 + $0x568] sm:$0xff] %v2072_v37 }
 0x396   : > { %v1653_v14 = vpop.f32.mrf.mxu3 }
 0x397   : > { %v1654_v56 = vadd.f32 %v1653_v14, %v1444_v54 }
 0x399   : > { %2843 = vst [vmem:[%s3638_s19 + $0x560] sm:$0xff] %v1654_v56 }
 0x39a   : > { %v1865_v42 = vpop.f32.mrf.mxu0  ;;  %v2074_v43 = vpop.f32.mrf.mxu1 }
 0x39b   : > { %v2075_v57 = vadd.f32 %v2074_v43, %v1865_v42 }
 0x39d   : > { %v1447_v15 = vpop.f32.mrf.mxu2  ;;  %2847 = vst [vmem:[%s3638_s19 + $0x580] sm:$0xff] %v2075_v57 }
 0x39e   : > { %v1656_v25 = vpop.f32.mrf.mxu3 }
 0x39f   : > { %v1657_v55 = vadd.f32 %v1656_v25, %v1447_v15 }
 0x3a1   : > { %2846 = vst [vmem:[%s3638_s19 + $0x578] sm:$0xff] %v1657_v55 }
 0x3a2   : > { %v1868_v61 = vpop.f32.mrf.mxu0  ;;  %v2077_v1 = vpop.f32.mrf.mxu1 }
 0x3a3   : > { %v2078_v16 = vadd.f32 %v2077_v1, %v1868_v61 }
 0x3a5   : > { %v1450_v38 = vpop.f32.mrf.mxu2  ;;  %2850 = vst [vmem:[%s3638_s19 + $0x598] sm:$0xff] %v2078_v16 }
 0x3a6   : > { %v1659_v4 = vpop.f32.mrf.mxu3 }
 0x3a7   : > { %v1660_v39 = vadd.f32 %v1659_v4, %v1450_v38 }
 0x3a9   : > { %2849 = vst [vmem:[%s3638_s19 + $0x590] sm:$0xff] %v1660_v39 }
 0x3aa   : > { %v1871_v5 = vpop.f32.mrf.mxu0  ;;  %v2080_v19 = vpop.f32.mrf.mxu1 }
 0x3ab   : > { %v2081_v52 = vadd.f32 %v2080_v19, %v1871_v5 }
 0x3ad   : > { %v1453_v53 = vpop.f32.mrf.mxu2  ;;  %2853 = vst [vmem:[%s3638_s19 + $0x5b0] sm:$0xff] %v2081_v52 }
 0x3ae   : > { %v1662_v22 = vpop.f32.mrf.mxu3 }
 0x3af   : > { %v1663_v23 = vadd.f32 %v1662_v22, %v1453_v53 }
 0x3b1   : > { %2852 = vst [vmem:[%s3638_s19 + $0x5a8] sm:$0xff] %v1663_v23 }
 0x3b2   : > { %v1874_v46 = vpop.f32.mrf.mxu0  ;;  %v2083_v8 = vpop.f32.mrf.mxu1 }
 0x3b3   : > { %v2084_v9 = vadd.f32 %v2083_v8, %v1874_v46 }
 0x3b5   : > { %v1456_v62 = vpop.f32.mrf.mxu2  ;;  %2856 = vst [vmem:[%s3638_s19 + $0x5c8] sm:$0xff] %v2084_v9 }
 0x3b6   : > { %v1665_v24 = vpop.f32.mrf.mxu3 }
 0x3b7   : > { %v1666_v30 = vadd.f32 %v1665_v24, %v1456_v62 }
 0x3b9   : > { %2855 = vst [vmem:[%s3638_s19 + $0x5c0] sm:$0xff] %v1666_v30 }
 0x3ba   : > { %v1877_v63 = vpop.f32.mrf.mxu0  ;;  %v2086_v33 = vpop.f32.mrf.mxu1 }
 0x3bb   : > { %v2087_v26 = vadd.f32 %v2086_v33, %v1877_v63 }
 0x3bd   : > { %v1459_v20 = vpop.f32.mrf.mxu2  ;;  %2859 = vst [vmem:[%s3638_s19 + $0x5e0] sm:$0xff] %v2087_v26 }
 0x3be   : > { %v1668_v21 = vpop.f32.mrf.mxu3 }
 0x3bf   : > { %v1669_v27 = vadd.f32 %v1668_v21, %v1459_v20 }
 0x3c1   : > { %2858 = vst [vmem:[%s3638_s19 + $0x5d8] sm:$0xff] %v1669_v27 }
 0x3c2   : > { %v1880_v47 = vpop.f32.mrf.mxu0  ;;  %v2089_v6 = vpop.f32.mrf.mxu1 }
 0x3c3   : > { %v2090_v18 = vadd.f32 %v2089_v6, %v1880_v47 }
 0x3c5   : > { %v1462_v28 = vpop.f32.mrf.mxu2  ;;  %2862 = vst [vmem:[%s3638_s19 + $0x5f8] sm:$0xff] %v2090_v18 }
 0x3c6   : > { %v1671_v31 = vpop.f32.mrf.mxu3 }
 0x3c7   : > { %v1672_v2 = vadd.f32 %v1671_v31, %v1462_v28 }
 0x3c9   : > { %2861 = vst [vmem:[%s3638_s19 + $0x5f0] sm:$0xff] %v1672_v2 }
 0x3ca   : > { %3271 = shalt.err (!%p3268_p0)
}
 0x3cb   : > { %s3338_s30 = smov 384   ;;  %s3339_s5 = smov 768  }
 0x3cc   : > { %s3340_s6 = smov 24  }
 0x3cd   : > { %3043 = dma.vmem_to_hbm [thread:$0]  (%p3431_p5), %s2880_s21, 24576, %s2882_s22, %s2864_s12, %s3338_s30, %s3339_s5, %s3340_s6  }
 0x3ce PF: > { %s2896_s17 = sand.u32 1, %s3310_s9   ;;  %p3054_p3 = pnand %p2993_p11, %p3405_p6 }
 0x3cf   : > { %s2897_s19 = scalar_lea.sflag [#allocation5], %s2896_s17 }
 0x3d0   : > { %p3055_p7 = pneg %p3054_p3 }
 0x3d2   : > { %3305 = dma.done.wait (%p3055_p7), %s2897_s19, 24576  }
 0x3d3   : > { %3307 = vsyncadd (%p3055_p7), %s2897_s19, 4294942720  ;;  %s19_s14 = sadd.s32 1, %s3330_s14   ;;  %s4164_s9 = smov %s3314_s10 }
 0x3d4   : > { %p16_p9 = scmp.ge.s32.totalorder %s19_s14, 4   ;;  %s4165_s10 = smov %s3318_s11 }
 0x3d5   : > { %s4166_s11 = smov %s3440_s7  ;;  %s4167_s12 = smov %s3326_s13 }
 0x3d6   : > { %s4168_s13 = smov %s4170_s29  ;;  %18 = sbr.rel (!%p16_p9) target bundleno = 7 (0x7), region = 87 }
 0x3db   :  { %2903 = vsyncpa [#allocation4], 1 }
 0x3dc   :  { %2905 = vsyncpa [#allocation4 + $0x1], 1 }
 0x3dd   :  { %2906 = vsyncpa [#allocation7], 1 }
 0x3de   :  { %2908 = vsyncpa [#allocation7 + $0x1], 1 }
 0x3df   :  { %2909 = vsyncpa [#allocation5], 1 }
 0x3e0   :  { %2911 = vsyncpa [#allocation5 + $0x1], 1 }

</bundles_post_ra>
